<compile_context>
chip_gen: v7x
topology: tpu7x:2x2x1
jax: 0.10.0
libtpu: 0.0.40
codegen_flags: <defaults>
</compile_context>

<pallas_src>
import functools
import math

import jax
import jax.numpy as jnp
from jax.experimental import pallas as pl
from jax.experimental.pallas import tpu as pltpu

BN_EPS = 1e-5
# Safe scoped-VMEM cap on all generations (v5e/v6e: 128 MiB physical, v7x: 64 MiB).
VMEM_LIMIT_BYTES = 32 * 1024 * 1024


def _round_up(x, m):
    return (x + m - 1) // m * m


def _pick_tile(dim, max_tile):
    """Largest tile <= max_tile that divides `dim` (no padding); 128-granular."""
    if dim <= max_tile:
        return dim, dim
    t = (max_tile // 128) * 128
    while t >= 128:
        if dim % t == 0:
            return t, dim
        t -= 128
    # Fallback (never hit for ResNet-50 shapes): pad to a multiple of 128.
    return 128, _round_up(dim, 128)


# ------------------------- Pallas kernels -------------------------

def _mm_bn_kernel(a_ref, w_ref, sb_ref, o_ref, acc_ref, *, relu):
    """Tiled bf16 matmul, f32 accumulator, fused folded-BN affine (+ReLU)."""
    @pl.when(pl.program_id(2) == 0)
    def _():
        acc_ref[...] = jnp.zeros_like(acc_ref)

    acc_ref[...] += jnp.dot(a_ref[...], w_ref[...], preferred_element_type=jnp.float32)

    @pl.when(pl.program_id(2) == pl.num_programs(2) - 1)
    def _():
        y = acc_ref[...] * sb_ref[0:1, :] + sb_ref[1:2, :]
        if relu:
            y = jnp.maximum(y, 0.0)
        o_ref[...] = y.astype(o_ref.dtype)


def _mm_bn_res_kernel(a_ref, w_ref, sb_ref, r_ref, o_ref, acc_ref, *, relu):
    """Same as above plus fused residual add before the ReLU."""
    @pl.when(pl.program_id(2) == 0)
    def _():
        acc_ref[...] = jnp.zeros_like(acc_ref)

    acc_ref[...] += jnp.dot(a_ref[...], w_ref[...], preferred_element_type=jnp.float32)

    @pl.when(pl.program_id(2) == pl.num_programs(2) - 1)
    def _():
        y = acc_ref[...] * sb_ref[0:1, :] + sb_ref[1:2, :]
        y = y + r_ref[...].astype(jnp.float32)
        if relu:
            y = jnp.maximum(y, 0.0)
        o_ref[...] = y.astype(o_ref.dtype)


def _conv3x3_s1_kernel(x_ref, w_ref, sb_ref, o_ref, acc_ref, *, relu):
    """3x3 / stride-1 / pad-1 conv with the window walk fused in-kernel.

    The whole padded image block lives in VMEM; the 9 window offsets are 9
    shifted MXU matmuls accumulated in a f32 VMEM scratch (no im2col in HBM).
    Epilogue applies folded eval-mode BatchNorm (+ReLU).
    """
    Ho, Wo, _ = o_ref.shape          # output spatial block (== full image here)
    cin = x_ref.shape[-1]
    for o in range(9):
        di, dj = divmod(o, 3)
        a = x_ref[di:di + Ho, dj:dj + Wo, :].reshape(Ho * Wo, cin)
        p = jnp.dot(a, w_ref[o], preferred_element_type=jnp.float32)
        if o == 0:
            acc_ref[...] = p
        else:
            acc_ref[...] += p
    y = acc_ref[...] * sb_ref[0:1, :] + sb_ref[1:2, :]
    if relu:
        y = jnp.maximum(y, 0.0)
    o_ref[...] = y.reshape(Ho, Wo, -1).astype(o_ref.dtype)


def _gem_head_kernel(x_ref, sb_ref, o_ref, *, p, gem_eps, norm_eps):
    # GeneralizedMeanPoolingP (p=3): (mean(clamp(x,eps)^p))^(1/p),
    # then folded eval-mode BatchNorm1d, then F.normalize (L2).
    x = jnp.maximum(x_ref[...].astype(jnp.float32), gem_eps)   # (HW, C)
    m = jnp.mean(x * x * x, axis=0, keepdims=True)             # p == 3 -> cube
    y = jnp.exp(jnp.log(m) * (1.0 / p))                        # m^(1/p), m > 0
    y = y * sb_ref[0:1, :] + sb_ref[1:2, :]                    # BatchNorm1d folded
    nrm = jnp.sqrt(jnp.sum(y * y, axis=-1, keepdims=True))
    o_ref[...] = y / jnp.maximum(nrm, norm_eps)


# ------------------------- Pallas wrappers -------------------------

def _fused_matmul_bn(A, W, sb, R, relu, out_dtype):
    """out = maybe_relu((A @ W) * scale + bias [+ R]); A/W/R bf16, sb=(2,N) f32."""
    M, K = A.shape
    _, N = W.shape
    tm, Mp = _pick_tile(M, 512)
    tk, Kp = _pick_tile(K, 2048)
    tn, Np = _pick_tile(N, 512)
    # Keep >= 2 blocks on the parallel axes so v7x's second TensorCore has work.
    if (Mp // tm) * (Np // tn) < 2:
        if tn % 256 == 0:
            tn //= 2
        elif tm % 256 == 0:
            tm //= 2

    # TODO(synk): replace this padding fallback with a ceil-div grid + masked
    # epilogue store; it is never hit for ResNet-50 shapes.
    if Mp != M:
        A = jnp.pad(A, ((0, Mp - M), (0, 0)))
        if R is not None:
            R = jnp.pad(R, ((0, Mp - M), (0, 0)))
    if Kp != K:
        A = jnp.pad(A, ((0, 0), (0, Kp - K)))
        W = jnp.pad(W, ((0, Kp - K), (0, 0)))
    if Np != N:
        W = jnp.pad(W, ((0, 0), (0, Np - N)))
        sb = jnp.pad(sb, ((0, 0), (0, Np - N)))
        if R is not None:
            R = jnp.pad(R, ((0, 0), (0, Np - N)))

    grid = (Mp // tm, Np // tn, Kp // tk)
    in_specs = [
        pl.BlockSpec((tm, tk), lambda i, j, k: (i, k)),
        pl.BlockSpec((tk, tn), lambda i, j, k: (k, j)),
        pl.BlockSpec((2, tn), lambda i, j, k: (0, j)),
    ]
    if R is None:
        kernel = functools.partial(_mm_bn_kernel, relu=relu)
        args = (A, W, sb)
    else:
        in_specs.append(pl.BlockSpec((tm, tn), lambda i, j, k: (i, j)))
        kernel = functools.partial(_mm_bn_res_kernel, relu=relu)
        args = (A, W, sb, R)

    def _nbytes(a):
        return a.size * a.dtype.itemsize

    bytes_accessed = (_nbytes(A) + _nbytes(W) + _nbytes(sb)
                      + Mp * Np * jnp.dtype(out_dtype).itemsize
                      + (_nbytes(R) if R is not None else 0))
    cost = pl.CostEstimate(flops=2 * Mp * Np * Kp, transcendentals=0,
                           bytes_accessed=bytes_accessed)

    out = pl.pallas_call(
        kernel,
        out_shape=jax.ShapeDtypeStruct((Mp, Np), out_dtype),
        grid=grid,
        in_specs=in_specs,
        out_specs=pl.BlockSpec((tm, tn), lambda i, j, k: (i, j)),
        scratch_shapes=[pltpu.VMEM((tm, tn), jnp.float32)],
        compiler_params=pltpu.CompilerParams(
            dimension_semantics=("parallel", "parallel", "arbitrary"),
            vmem_limit_bytes=VMEM_LIMIT_BYTES),
        cost_estimate=cost,
    )(*args)
    if Mp != M or Np != N:
        out = out[:M, :N]
    return out


@functools.partial(jax.jit, static_argnames=("relu",))
def _conv3x3_s1_bn(x, w, sb, *, relu):
    """3x3 stride-1 pad-1 conv + folded BN (+ReLU); window walk fused in-kernel.

    The activation is read from HBM exactly once (single pad copy, no im2col)."""
    N, H, W_, Cin = x.shape
    Cout = w.shape[-1]
    xp = jnp.pad(x, ((0, 0), (1, 1), (1, 1), (0, 0)))
    Hp, Wp = H + 2, W_ + 2
    tn = 256 if Cout % 256 == 0 else Cout        # split Cout so grids stay >= 2 blocks
    grid = (N, Cout // tn)

    bytes_accessed = (xp.size * xp.dtype.itemsize + w.size * w.dtype.itemsize
                      + sb.size * sb.dtype.itemsize + N * H * W_ * Cout * 2)
    cost = pl.CostEstimate(flops=2 * N * H * W_ * 9 * Cin * Cout,
                           transcendentals=0, bytes_accessed=bytes_accessed)

    return pl.pallas_call(
        functools.partial(_conv3x3_s1_kernel, relu=relu),
        out_shape=jax.ShapeDtypeStruct((N, H, W_, Cout), jnp.bfloat16),
        grid=grid,
        in_specs=[
            pl.BlockSpec((None, Hp, Wp, Cin), lambda n, j: (n, 0, 0, 0)),
            pl.BlockSpec((9, Cin, tn), lambda n, j: (0, 0, j)),
            pl.BlockSpec((2, tn), lambda n, j: (0, j)),
        ],
        out_specs=pl.BlockSpec((None, H, W_, tn), lambda n, j: (n, 0, 0, j)),
        scratch_shapes=[pltpu.VMEM((H * W_, tn), jnp.float32)],
        compiler_params=pltpu.CompilerParams(
            dimension_semantics=("parallel", "parallel"),
            vmem_limit_bytes=VMEM_LIMIT_BYTES),
        cost_estimate=cost,
    )(xp, w, sb)


@jax.jit
def gem_bn_normalize(x, sb):
    N, H, W, C = x.shape
    HW = H * W
    xr = x.reshape(N, HW, C)
    out = pl.pallas_call(
        functools.partial(_gem_head_kernel, p=3.0, gem_eps=1e-6, norm_eps=1e-12),
        out_shape=jax.ShapeDtypeStruct((N, 1, C), jnp.float32),
        grid=(N,),
        in_specs=[
            pl.BlockSpec((None, HW, C), lambda i: (i, 0, 0)),   # kernel sees (HW, C)
            pl.BlockSpec((2, C), lambda i: (0, 0)),
        ],
        out_specs=pl.BlockSpec((None, 1, C), lambda i: (i, 0, 0)),
        compiler_params=pltpu.CompilerParams(dimension_semantics=("parallel",)),
    )(xr, sb)
    return out.reshape(N, C)


# ------------------------- JAX glue (maxpool, im2col, conv wrapper) -------------------------

@jax.jit
def maxpool_3x3_s2_p1(x):
    """MaxPool2d(3, stride=2, padding=1) on NHWC, as a fused 9-way maximum.
    TODO(synk): fold the 9-way max into the following conv's Pallas prologue to
    save one activation round-trip."""
    N, H, W, C = x.shape
    neg = jnp.finfo(x.dtype).min
    xp = jnp.pad(x, ((0, 0), (1, 1), (1, 1), (0, 0)), constant_values=neg)
    Ho = (H + 2 - 3) // 2 + 1
    Wo = (W + 2 - 3) // 2 + 1
    out = None
    for i in range(3):
        for j in range(3):
            s = xp[:, i:i + 2 * (Ho - 1) + 1:2, j:j + 2 * (Wo - 1) + 1:2, :]
            out = s if out is None else jnp.maximum(out, s)
    return out


def im2col(x, kh, kw, stride, pad):
    # Only used for conv1 (7x7/s2), the three stride-2 3x3 convs and tiny-spatial
    # stages (W % 8 != 0); the stride-1 3x3 convs use the fused window kernel.
    N, H, W, C = x.shape
    xp = jnp.pad(x, ((0, 0), (pad, pad), (pad, pad), (0, 0)))
    Ho = (H + 2 * pad - kh) // stride + 1
    Wo = (W + 2 * pad - kw) // stride + 1
    cols = []
    for i in range(kh):
        for j in range(kw):
            cols.append(xp[:, i:i + stride * (Ho - 1) + 1:stride,
                            j:j + stride * (Wo - 1) + 1:stride, :])
    patches = jnp.stack(cols, axis=3)                    # (N, Ho, Wo, kh*kw, C)
    return patches.reshape(N * Ho * Wo, kh * kw * C), Ho, Wo


@functools.partial(jax.jit, static_argnames=("kh", "kw", "stride", "pad", "relu"))
def _conv_bn_impl(x, w, sb, residual, *, kh, kw, stride, pad, relu):
    N, H, W_, C = x.shape
    if kh == 1 and kw == 1:
        # TODO(synk): express the stride-2 slice in the A BlockSpec instead of XLA.
        xs = x[:, ::stride, ::stride, :]
        Ho, Wo = xs.shape[1], xs.shape[2]
        A = xs.reshape(N * Ho * Wo, C)
    else:
        A, Ho, Wo = im2col(x, kh, kw, stride, pad)
    if w.ndim == 3:                                       # 3x3 weights stored window-major
        w = w.reshape(-1, w.shape[-1])
    if A.shape[1] != w.shape[0]:                          # lane-align K (conv1: 147 -> 256)
        A = jnp.pad(A, ((0, 0), (0, w.shape[0] - A.shape[1])))
    R = None if residual is None else residual.reshape(N * Ho * Wo, -1)
    out = _fused_matmul_bn(A, w, sb, R, relu, jnp.bfloat16)
    return out.reshape(N, Ho, Wo, -1)


def conv_bn(x, cb, stride, pad, relu, residual=None):
    """Conv2d(bias=False) + eval-mode BatchNorm2d (+ residual) (+ ReLU), NHWC bf16."""
    kh, kw = cb['kh'], cb['kw']
    if (kh == 3 and kw == 3 and stride == 1 and pad == 1 and residual is None
            and x.shape[2] % 8 == 0):
        return _conv3x3_s1_bn(x, cb['w'], cb['sb'], relu=relu)
    return _conv_bn_impl(x, cb['w'], cb['sb'], residual,
                         kh=kh, kw=kw, stride=stride, pad=pad, relu=relu)


# ------------------------- Parameters (pre-folded, pre-laid-out) -------------------------

def _bn_fold(key, c):
    k1, k2, k3, k4 = jax.random.split(key, 4)
    gamma = 1.0 + 0.1 * jax.random.normal(k1, (c,), jnp.float32)
    beta = 0.1 * jax.random.normal(k2, (c,), jnp.float32)
    mean = 0.1 * jax.random.normal(k3, (c,), jnp.float32)
    var = 1.0 + 0.1 * jax.random.uniform(k4, (c,), jnp.float32)
    s = gamma / jnp.sqrt(var + BN_EPS)
    b = beta - mean * s
    return jnp.stack([s, b])                              # (2, C) f32


def make_conv_bn(key, cout, cin, kh, kw):
    kconv, kbn = jax.random.split(key)
    # matches ResNet.random_init: N(0, sqrt(2 / (kh*kw*cout)))
    n = kh * kw * cout
    w = jax.random.normal(kconv, (cout, cin, kh, kw), jnp.float32) * math.sqrt(2.0 / n)
    wt = jnp.transpose(w, (2, 3, 1, 0))                   # (kh, kw, cin, cout)
    if kh == 3 and kw == 3:
        # window-major layout for the fused 3x3 kernel; reshaped (free) for im2col use
        wp = wt.reshape(kh * kw, cin, cout).astype(jnp.bfloat16)
    else:
        K = kh * kw * cin
        Kp = _round_up(K, 128) if (K > 128 and K % 128 != 0) else K
        wp = wt.reshape(K, cout)
        if Kp != K:                                       # conv1: K 147 -> 256 (dense lanes)
            wp = jnp.pad(wp, ((0, Kp - K), (0, 0)))
        wp = wp.astype(jnp.bfloat16)
    return dict(w=wp, sb=_bn_fold(kbn, cout), kh=kh, kw=kw)


def init_resnet_params(key, layers=(3, 4, 6, 3), last_stride=2):
    keys = jax.random.split(key, 3 + len(layers))
    params = {
        'conv1': make_conv_bn(keys[0], 64, 3, 7, 7),
        'feat_bn0_sb': _bn_fold(keys[1], 2048),           # BatchNorm1d(2048), eval mode
    }
    inplanes = 64
    strides = [1, 2, 2, last_stride]
    planes_list = [64, 128, 256, 512]
    for li, (planes, nblocks, stride) in enumerate(zip(planes_list, layers, strides)):
        lkeys = jax.random.split(keys[3 + li], nblocks)
        blocks = []
        for bi in range(nblocks):
            s = stride if bi == 0 else 1
            need_ds = (bi == 0) and (s != 1 or inplanes != planes * 4)
            bkeys = jax.random.split(lkeys[bi], 4)
            bp = dict(
                conv1=make_conv_bn(bkeys[0], planes, inplanes, 1, 1),
                conv2=make_conv_bn(bkeys[1], planes, planes, 3, 3),
                conv3=make_conv_bn(bkeys[2], planes * 4, planes, 1, 1),
                stride=s,
            )
            if need_ds:
                bp['ds'] = make_conv_bn(bkeys[3], planes * 4, inplanes, 1, 1)
            blocks.append(bp)
            inplanes = planes * 4
        params[f'layer{li + 1}'] = blocks
    return params


# ------------------------- Forward -------------------------

def bottleneck_forward(x, p):
    # TODO(synk): fuse whole bottleneck blocks (conv1->conv2->conv3+res+relu) for
    # the small-spatial stages into a single pallas_call to cut launch overhead.
    s = p['stride']
    out = conv_bn(x, p['conv1'], 1, 0, relu=True)
    out = conv_bn(out, p['conv2'], s, 1, relu=True)
    if 'ds' in p:
        residual = conv_bn(x, p['ds'], s, 0, relu=False)
    else:
        residual = x
    # conv3 -> bn3 -> += residual -> relu, fused in the matmul kernel epilogue
    out = conv_bn(out, p['conv3'], 1, 0, relu=True, residual=residual)
    return out


def resnet_forward(x_nchw, params):
    # Matches the reference forward (style=False path):
    # conv1 -> bn1 -> maxpool (NO ReLU after bn1 in the reference forward),
    # layer1..layer4, GEM pooling, BatchNorm1d (eval), F.normalize.
    x = jnp.transpose(x_nchw, (0, 2, 3, 1)).astype(jnp.bfloat16)   # NCHW -> NHWC bf16
    x = conv_bn(x, params['conv1'], stride=2, pad=3, relu=False)
    x = maxpool_3x3_s2_p1(x)
    for name in ('layer1', 'layer2', 'layer3', 'layer4'):
        for bp in params[name]:
            x = bottleneck_forward(x, bp)
    # TODO(synk): StyleRandomization branch (only taken when style=True) is not implemented.
    return gem_bn_normalize(x, params['feat_bn0_sb'])


if __name__ == "__main__":
    key = jax.random.PRNGKey(0)
    kp, kx = jax.random.split(key)
    params = init_resnet_params(kp)
    x = jax.random.normal(kx, (2, 3, 64, 64), jnp.float32)   # NCHW, like PyTorch input
    feat = resnet_forward(x, params)
    feat = jax.block_until_ready(feat)
    assert feat.shape == (2, 2048), feat.shape
    assert bool(jnp.all(jnp.isfinite(feat)))
    print("KERNEL_OK")
</pallas_src>

<mosaic_0001>
module attributes {stable_mosaic.version = 11 : i64} {
  func.func @_mm_bn_kernel(%arg0: i32, %arg1: i32, %arg2: i32, %arg3: memref<512x256xbf16, #tpu.memory_space<vmem>>, %arg4: memref<256x64xbf16, #tpu.memory_space<vmem>>, %arg5: memref<2x64xf32, #tpu.memory_space<vmem>>, %arg6: memref<512x64xbf16, #tpu.memory_space<vmem>>, %arg7: memref<512x64xf32, #tpu.memory_space<vmem>>) attributes {dimension_semantics = [#tpu.dimension_semantics<parallel>, #tpu.dimension_semantics<parallel>, #tpu.dimension_semantics<arbitrary>], iteration_bounds = array<i64: 4, 1, 1>, scalar_prefetch = 0 : i64, scratch_operands = 1 : i64, tpu.core_type = #tpu.core_type<tc>, window_params = [{transform_indices = @transform_0, window_bounds = array<i64: 512, 256>}, {transform_indices = @transform_1, window_bounds = array<i64: 256, 64>}, {transform_indices = @transform_2, window_bounds = array<i64: 2, 64>}, {transform_indices = @transform_3, window_bounds = array<i64: 512, 64>}]} {
    %c0_i32 = arith.constant 0 : i32
    %0 = arith.cmpi eq, %arg2, %c0_i32 : i32
    %1 = arith.extui %0 : i1 to i32
    %c0_i32_0 = arith.constant 0 : i32
    %2 = arith.cmpi ne, %1, %c0_i32_0 : i32
    scf.if %2 {
      %cst_10 = arith.constant 0.000000e+00 : f32
      %12 = vector.broadcast %cst_10 : f32 to vector<512x64xf32>
      %c0_11 = arith.constant 0 : index
      %c0_12 = arith.constant 0 : index
      %13 = vector.load %arg7[%c0_11, %c0_12] : memref<512x64xf32, #tpu.memory_space<vmem>>, vector<512x64xf32>
      tpu.vector_store %arg7[%c0_11, %c0_12], %12 {strides = array<i32>} : memref<512x64xf32, #tpu.memory_space<vmem>>, vector<512x64xf32>,
    } else {
    }
    %c0 = arith.constant 0 : index
    %c0_1 = arith.constant 0 : index
    %3 = vector.load %arg7[%c0, %c0_1] : memref<512x64xf32, #tpu.memory_space<vmem>>, vector<512x64xf32>
    %c0_2 = arith.constant 0 : index
    %c0_3 = arith.constant 0 : index
    %4 = vector.load %arg3[%c0_2, %c0_3] : memref<512x256xbf16, #tpu.memory_space<vmem>>, vector<512x256xbf16>
    %c0_4 = arith.constant 0 : index
    %c0_5 = arith.constant 0 : index
    %5 = vector.load %arg4[%c0_4, %c0_5] : memref<256x64xbf16, #tpu.memory_space<vmem>>, vector<256x64xbf16>
    %cst = arith.constant dense<0.000000e+00> : vector<512x64xf32>
    %6 = tpu.matmul %4, %5, %cst {dimension_numbers = #tpu.dot_dimension_numbers<[1], [0], [0], [1], [0, 0, 1, 1], [], []>} : vector<512x256xbf16>, vector<256x64xbf16>, vector<512x64xf32> -> vector<512x64xf32>
    %7 = arith.addf %3, %6 : vector<512x64xf32>
    %c0_6 = arith.constant 0 : index
    %c0_7 = arith.constant 0 : index
    %8 = vector.load %arg7[%c0_6, %c0_7] : memref<512x64xf32, #tpu.memory_space<vmem>>, vector<512x64xf32>
    tpu.vector_store %arg7[%c0_6, %c0_7], %7 {strides = array<i32>} : memref<512x64xf32, #tpu.memory_space<vmem>>, vector<512x64xf32>,
    %c0_i32_8 = arith.constant 0 : i32
    %9 = arith.cmpi eq, %arg2, %c0_i32_8 : i32
    %10 = arith.extui %9 : i1 to i32
    %c0_i32_9 = arith.constant 0 : i32
    %11 = arith.cmpi ne, %10, %c0_i32_9 : i32
    scf.if %11 {
      %c0_10 = arith.constant 0 : index
      %c0_11 = arith.constant 0 : index
      %12 = vector.load %arg7[%c0_10, %c0_11] : memref<512x64xf32, #tpu.memory_space<vmem>>, vector<512x64xf32>
      %c0_12 = arith.constant 0 : index
      %c0_13 = arith.constant 0 : index
      %13 = vector.load %arg5[%c0_12, %c0_13] : memref<2x64xf32, #tpu.memory_space<vmem>>, vector<1x64xf32>
      %14 = vector.broadcast %13 : vector<1x64xf32> to vector<512x64xf32>
      %15 = arith.mulf %12, %14 : vector<512x64xf32>
      %c1 = arith.constant 1 : index
      %c0_14 = arith.constant 0 : index
      %16 = vector.load %arg5[%c1, %c0_14] : memref<2x64xf32, #tpu.memory_space<vmem>>, vector<1x64xf32>
      %17 = vector.broadcast %16 : vector<1x64xf32> to vector<512x64xf32>
      %18 = arith.addf %15, %17 : vector<512x64xf32>
      %19 = arith.truncf %18 : vector<512x64xf32> to vector<512x64xbf16>
      %c0_15 = arith.constant 0 : index
      %c0_16 = arith.constant 0 : index
      %20 = vector.load %arg6[%c0_15, %c0_16] : memref<512x64xbf16, #tpu.memory_space<vmem>>, vector<512x64xbf16>
      tpu.vector_store %arg6[%c0_15, %c0_16], %19 {strides = array<i32>} : memref<512x64xbf16, #tpu.memory_space<vmem>>, vector<512x64xbf16>,
    } else {
    }
    return
  }
  func.func @transform_0(%arg0: i32, %arg1: i32, %arg2: i32) -> (i32, i32) {
    %c0_i32 = arith.constant 0 : i32
    return %arg0, %arg2 : i32, i32
  }
  func.func @transform_1(%arg0: i32, %arg1: i32, %arg2: i32) -> (i32, i32) {
    %c0_i32 = arith.constant 0 : i32
    return %arg2, %arg1 : i32, i32
  }
  func.func @transform_2(%arg0: i32, %arg1: i32, %arg2: i32) -> (i32, i32) {
    %c0_i32 = arith.constant 0 : i32
    %c0_i32_0 = arith.constant 0 : i32
    return %c0_i32, %arg1 : i32, i32
  }
  func.func @transform_3(%arg0: i32, %arg1: i32, %arg2: i32) -> (i32, i32) {
    %c0_i32 = arith.constant 0 : i32
    return %arg0, %arg1 : i32, i32
  }
}

</mosaic_0001>

<bundles_post_ra>
// kernel: _conv_bn_impl.1
= control target key start
LH: loop header
LB: loop body
LE: loop exit
PB: predicated region body
PF: predicated region fallthrough
CT: control target
= control target key end

     0   :  { %8 = vsyncpa [#allocation4], 0  ;;  %s3258_s0 = inlined_call_operand.vmem [shape: bf16[2048,256], index: 0, kind: input, shape index: {}]   ;;  %s3259_s1 = inlined_call_operand.vmem [shape: bf16[256,64], index: 1, kind: input, shape index: {}]   ;;  %s3260_s2 = inlined_call_operand.vmem [shape: f32[2,64], index: 2, kind: input, shape index: {}]   ;;  %s3261_s3 = inlined_call_operand.hbm [shape: bf16[2048,64], index: 3, kind: output, shape index: {}]  }
   0x1   :  { %10 = vsyncpa [#allocation4 + $0x1], 0  ;;  %s2519_s12 = smov 0   ;;  %s2521_s13 = smov 0  }
   0x2   :  { %s2523_s14 = smov 0   ;;  %s2525_s15 = smov 0  }
   0x3   :  { %s2527_s16 = smov 0   ;;  %s2529_s17 = smov 0  }
   0x4 LB: > { %s1981_s18 = sadd.s32 4294967295, %s2492_s17   ;;  %s1982_s19 = sadd.s32 4294967294, %s2492_s17   ;;  %s2492_s17 = sphi %s2529_s17, %s16_s17   ;;  %s2488_s16 = sphi %s2527_s16, %s3268_s16   ;;  %s2484_s15 = sphi %s2525_s15, %s3267_s15   ;;  %s2480_s14 = sphi %s2523_s14, %s3266_s14   ;;  %s2476_s13 = sphi %s2521_s13, %s3265_s13   ;;  %s2472_s12 = sphi %s2519_s12, %s3264_s12  }
   0x5   : > { %s35_s20 = sadd.s32 1, %s2488_s16  ;;  %s126_s21 = sadd.s32 1, %s2480_s14 }
   0x6   : > { %p37_p0 = scmp.ge.s32.totalorder %s35_s20, 4  ;;  %p136_p1 = scmp.ne.s32.totalorder %s2480_s14, %s2476_s13 }
   0x7   : > { %p137_p2 = scmp.eq.s32.totalorder %s1981_s18, 3  ;;  %p142_p3 = scmp.ne.s32.totalorder %s2476_s13, %s2472_s12 }
   0x8   : > { %s3270_s20 = smov (%p37_p0, %s35_s20), 0  ;;  %p143_p5 = scmp.eq.s32.totalorder %s1982_s19, 3 }
   0x9   : > { %p2559_p4 = por %p137_p2, %p136_p1  ;;  %s121_s23 = ssub.s32 %s2488_s16, %s3270_s20 }
   0xa   : > { %p1987_p6 = scmp.ge.s32.totalorder %s2492_s17, 1  ;;  %p124_p7 = scmp.eq.s32.totalorder %s121_s23, 0 }
   0xb   : > { %p2566_p8 = por %p143_p5, %p142_p3  ;;  %p195_p9 = scmp.lt.s32.totalorder %s2492_s17, 5 }
   0xc   : > { %s2572_s25 = scalar_select %p124_p7, %s2480_s14, %s126_s21  }
   0xd   : > { %p196_p10 = pnand %p1987_p6, %p195_p9 }
   0xe   : > { %v2300_v0 = vld [vmem:[%s3259_s1] sm:$0xff] (!%p196_p10)   ;;  %v2494_v1 = vmov (!%p196_p10), 0   ;;  %s1989_s28 = sshll.u32 (!%p196_p10), %s2484_s15, 6  ;;  %v2301_v2 = vld [vmem:[%s3259_s1 + $0x8] sm:$0xff] (!%p196_p10)   ;;  %v2302_v3 = vld [vmem:[%s3259_s1 + $0x10] sm:$0xff] (!%p196_p10)   ;;  %vm267_vm0 = vcmask (!%p196_p10), 523264  }
   0xf   : > { %199 = sbr.rel (%p196_p10) target bundleno = 447 (0x1bf), region = 32  ;;  %908 = vmatprep.subr.bf16.mxu0 (!%p196_p10), %v2494_v1  ;;  %2209 = vmatprep.subr.bf16.mxu1 (!%p196_p10), %v2494_v1  ;;  %p238_p11 = scmp.lt.s32.totalorder (!%p196_p10), %s1989_s28, 255  ;;  %v2303_v4 = vld [vmem:[%s3259_s1 + $0x18] sm:$0xff] (!%p196_p10)   ;;  %v2304_v5 = vld [vmem:[%s3259_s1 + $0x20] sm:$0xff] (!%p196_p10)   ;;  %v2305_v7 = vld [vmem:[%s3259_s1 + $0x28] sm:$0xff] (!%p196_p10)   ;;  %v2495_v19 = vmov (!%p196_p10), 0.0  }
  0x10   : > { %909 = vmatpush1.bf16.msra.mxu0 (!%p196_p10), %v2300_v0  ;;  %2225 = vmatpush1.bf16.msra.mxu1 (!%p196_p10), %v2300_v0  ;;  %v2306_v9 = vld [vmem:[%s3259_s1 + $0x30] sm:$0xff] (!%p196_p10)   ;;  %v2307_v10 = vld [vmem:[%s3259_s1 + $0x38] sm:$0xff] (!%p196_p10)   ;;  %v2308_v11 = vld [vmem:[%s3259_s1 + $0x40] sm:$0xff] (!%p196_p10)   ;;  %268 = vst.msk [vmem:[#allocation2] sm:$0xff] (!%p196_p10), %vm267_vm0, %v2495_v19  ;;  %vm1787_vm1 = vcmask (!%p196_p10), 519168   ;;  %s2208_s21 = sshll.u32 (!%p196_p10), %s2484_s15, 12 }
  0x11   : > { %910 = vmatprep.subr.bf16.mxu0 (!%p196_p10), %v2494_v1  ;;  %2210 = vmatprep.subr.bf16.mxu1 (!%p196_p10), %v2494_v1  ;;  %v2309_v12 = vld [vmem:[%s3259_s1 + $0x48] sm:$0xff] (!%p196_p10)   ;;  %v2310_v13 = vld [vmem:[%s3259_s1 + $0x50] sm:$0xff] (!%p196_p10)   ;;  %v2311_v14 = vld [vmem:[%s3259_s1 + $0x58] sm:$0xff] (!%p196_p10)   ;;  %269 = vst.msk [vmem:[#allocation2 + $0x8] sm:$0xff] (!%p196_p10), %vm267_vm0, %v2495_v19  ;;  %s2496_s30 = smov (!%p196_p10), [#allocation3]  }
  0x12   : > { %v2312_v15 = vld [vmem:[%s3259_s1 + $0x60] sm:$0xff] (!%p196_p10)   ;;  %v2313_v16 = vld [vmem:[%s3259_s1 + $0x68] sm:$0xff] (!%p196_p10)   ;;  %v2314_v17 = vld [vmem:[%s3259_s1 + $0x70] sm:$0xff] (!%p196_p10)   ;;  %270 = vst.msk [vmem:[#allocation2 + $0x10] sm:$0xff] (!%p196_p10), %vm267_vm0, %v2495_v19  ;;  %s2418_s4 = sshll.u32 (!%p196_p10), %s2496_s30, 4  ;;  %s2419_s4 = int_to_ptr.vmem [resolvable:$false] %s2418_s4 }
  0x13   : > { %v2660_v18 = vld [vmem:[%s3259_s1 + $0x78] sm:$0xff] (!%p196_p10)   ;;  %271 = vst.msk [vmem:[#allocation2 + $0x18] sm:$0xff] (!%p196_p10), %vm267_vm0, %v2495_v19  ;;  %272 = vst.msk [vmem:[#allocation2 + $0x20] sm:$0xff] (!%p196_p10), %vm267_vm0, %v2495_v19  ;;  %s2420_s5 = scalar_lea.vmem (!%p196_p10), %s2419_s4, 8192 }
  0x14   : > { %911 = vmatpush1.bf16.msra.mxu0 (!%p196_p10), %v2301_v2  ;;  %2226 = vmatpush1.bf16.msra.mxu1 (!%p196_p10), %v2301_v2  ;;  %273 = vst.msk [vmem:[#allocation2 + $0x28] sm:$0xff] (!%p196_p10), %vm267_vm0, %v2495_v19  ;;  %274 = vst.msk [vmem:[#allocation2 + $0x30] sm:$0xff] (!%p196_p10), %vm267_vm0, %v2495_v19 }
  0x15   : > { %912 = vmatprep.subr.bf16.mxu0 (!%p196_p10), %v2494_v1  ;;  %2211 = vmatprep.subr.bf16.mxu1 (!%p196_p10), %v2494_v1  ;;  %275 = vst.msk [vmem:[#allocation2 + $0x38] sm:$0xff] (!%p196_p10), %vm267_vm0, %v2495_v19  ;;  %276 = vst.msk [vmem:[#allocation2 + $0x40] sm:$0xff] (!%p196_p10), %vm267_vm0, %v2495_v19 }
  0x16   : > { %s3272_s28 = smov (!%p238_p11, %s1989_s28), 255  ;;  %277 = vst.msk [vmem:[#allocation2 + $0x48] sm:$0xff] %vm267_vm0, %v2495_v19  ;;  %278 = vst.msk [vmem:[#allocation2 + $0x50] sm:$0xff] %vm267_vm0, %v2495_v19 }
  0x17   : > { %s2143_s8 = sshll.u32 %s3272_s28, 3  ;;  %279 = vst.msk [vmem:[#allocation2 + $0x58] sm:$0xff] %vm267_vm0, %v2495_v19  ;;  %280 = vst.msk [vmem:[#allocation2 + $0x60] sm:$0xff] %vm267_vm0, %v2495_v19  ;;  %s3198_s28 = scalar_lea.hbm %s3261_s3, %s2208_s21 }
  0x18   : > { %913 = vmatpush1.bf16.msra.mxu0 %v2302_v3  ;;  %2227 = vmatpush1.bf16.msra.mxu1 %v2302_v3  ;;  %s2601_s19 = scalar_lea.vmem %s3258_s0, %s2143_s8  ;;  %281 = vst.msk [vmem:[#allocation2 + $0x68] sm:$0xff] %vm267_vm0, %v2495_v19  ;;  %282 = vst.msk [vmem:[#allocation2 + $0x70] sm:$0xff] %vm267_vm0, %v2495_v19 }
  0x19   : > { %914 = vmatprep.subr.bf16.mxu0 %v2494_v1  ;;  %2212 = vmatprep.subr.bf16.mxu1 %v2494_v1  ;;  %v2318_v6 = vld [vmem:[%s2601_s19 + $0x4] ss:$8 sps:$4 sm:$0xff]   ;;  %283 = vst.msk [vmem:[#allocation2 + $0x78] sm:$0xff] %vm267_vm0, %v2495_v19  ;;  %284 = vst.msk [vmem:[#allocation2 + $0x80] sm:$0xff] %vm267_vm0, %v2495_v19  ;;  %v2316_v20 = vld [vmem:[%s2601_s19] ss:$8 sps:$4 sm:$0xff]  }
  0x1a   : > { %v2321_v8 = vld [vmem:[%s2601_s19 + $0x104] ss:$8 sps:$4 sm:$0xff]   ;;  %940 = vmatprep.mubr.bf16.mxu0 %v2318_v6  ;;  %285 = vst.msk [vmem:[#allocation2 + $0x88] sm:$0xff] %vm267_vm0, %v2495_v19  ;;  %286 = vst.msk [vmem:[#allocation2 + $0x90] sm:$0xff] %vm267_vm0, %v2495_v19  ;;  %v2319_v21 = vld [vmem:[%s2601_s19 + $0x100] ss:$8 sps:$4 sm:$0xff]  }
  0x1b   : > { %1068 = vmatprep.mubr.bf16.mxu1 %v2321_v8  ;;  %287 = vst.msk [vmem:[#allocation2 + $0x98] sm:$0xff] %vm267_vm0, %v2495_v19  ;;  %288 = vst.msk [vmem:[#allocation2 + $0xa0] sm:$0xff] %vm267_vm0, %v2495_v19  ;;  %v2322_v22 = vld [vmem:[%s2601_s19 + $0x14] ss:$8 sps:$4 sm:$0xff]   ;;  %v2326_v24 = vld [vmem:[%s2601_s19 + $0x10] ss:$8 sps:$4 sm:$0xff]  }
  0x1c   : > { %915 = vmatpush1.bf16.msra.mxu0 %v2303_v4  ;;  %2228 = vmatpush1.bf16.msra.mxu1 %v2303_v4  ;;  %289 = vst.msk [vmem:[#allocation2 + $0xa8] sm:$0xff] %vm267_vm0, %v2495_v19  ;;  %290 = vst.msk [vmem:[#allocation2 + $0xb0] sm:$0xff] %vm267_vm0, %v2495_v19  ;;  %v2324_v23 = vld [vmem:[%s2601_s19 + $0x114] ss:$8 sps:$4 sm:$0xff]   ;;  %v2327_v25 = vld [vmem:[%s2601_s19 + $0x110] ss:$8 sps:$4 sm:$0xff]  }
  0x1d   : > { %916 = vmatprep.subr.bf16.mxu0 %v2494_v1  ;;  %2213 = vmatprep.subr.bf16.mxu1 %v2494_v1  ;;  %291 = vst.msk [vmem:[#allocation2 + $0xb8] sm:$0xff] %vm267_vm0, %v2495_v19  ;;  %292 = vst.msk [vmem:[#allocation2 + $0xc0] sm:$0xff] %vm267_vm0, %v2495_v19  ;;  %v2328_v26 = vld [vmem:[%s2601_s19 + $0x24] ss:$8 sps:$4 sm:$0xff]   ;;  %v2332_v28 = vld [vmem:[%s2601_s19 + $0x20] ss:$8 sps:$4 sm:$0xff]  }
  0x1e   : > { %293 = vst.msk [vmem:[#allocation2 + $0xc8] sm:$0xff] %vm267_vm0, %v2495_v19  ;;  %294 = vst.msk [vmem:[#allocation2 + $0xd0] sm:$0xff] %vm267_vm0, %v2495_v19  ;;  %v2330_v27 = vld [vmem:[%s2601_s19 + $0x124] ss:$8 sps:$4 sm:$0xff]   ;;  %v2333_v29 = vld [vmem:[%s2601_s19 + $0x120] ss:$8 sps:$4 sm:$0xff]  }
  0x1f   : > { %295 = vst.msk [vmem:[#allocation2 + $0xd8] sm:$0xff] %vm267_vm0, %v2495_v19  ;;  %296 = vst.msk [vmem:[#allocation2 + $0xe0] sm:$0xff] %vm267_vm0, %v2495_v19  ;;  %v2334_v30 = vld [vmem:[%s2601_s19 + $0x34] ss:$8 sps:$4 sm:$0xff]   ;;  %v2338_v32 = vld [vmem:[%s2601_s19 + $0x30] ss:$8 sps:$4 sm:$0xff]  }
  0x20   : > { %917 = vmatpush1.bf16.msra.mxu0 %v2304_v5  ;;  %2229 = vmatpush1.bf16.msra.mxu1 %v2304_v5  ;;  %297 = vst.msk [vmem:[#allocation2 + $0xe8] sm:$0xff] %vm267_vm0, %v2495_v19  ;;  %298 = vst.msk [vmem:[#allocation2 + $0xf0] sm:$0xff] %vm267_vm0, %v2495_v19  ;;  %v2336_v31 = vld [vmem:[%s2601_s19 + $0x134] ss:$8 sps:$4 sm:$0xff]   ;;  %v2339_v33 = vld [vmem:[%s2601_s19 + $0x130] ss:$8 sps:$4 sm:$0xff]  }
  0x21   : > { %918 = vmatprep.subr.bf16.mxu0 %v2494_v1  ;;  %2214 = vmatprep.subr.bf16.mxu1 %v2494_v1  ;;  %299 = vst.msk [vmem:[#allocation2 + $0xf8] sm:$0xff] %vm267_vm0, %v2495_v19  ;;  %300 = vst.msk [vmem:[#allocation2 + $0x100] sm:$0xff] %vm267_vm0, %v2495_v19  ;;  %v2340_v34 = vld [vmem:[%s2601_s19 + $0x44] ss:$8 sps:$4 sm:$0xff]   ;;  %v2344_v36 = vld [vmem:[%s2601_s19 + $0x40] ss:$8 sps:$4 sm:$0xff]  }
  0x22   : > { %301 = vst.msk [vmem:[#allocation2 + $0x108] sm:$0xff] %vm267_vm0, %v2495_v19  ;;  %302 = vst.msk [vmem:[#allocation2 + $0x110] sm:$0xff] %vm267_vm0, %v2495_v19  ;;  %v2342_v35 = vld [vmem:[%s2601_s19 + $0x144] ss:$8 sps:$4 sm:$0xff]   ;;  %v2345_v37 = vld [vmem:[%s2601_s19 + $0x140] ss:$8 sps:$4 sm:$0xff]  }
  0x23   : > { %303 = vst.msk [vmem:[#allocation2 + $0x118] sm:$0xff] %vm267_vm0, %v2495_v19  ;;  %304 = vst.msk [vmem:[#allocation2 + $0x120] sm:$0xff] %vm267_vm0, %v2495_v19  ;;  %v2346_v38 = vld [vmem:[%s2601_s19 + $0x54] ss:$8 sps:$4 sm:$0xff]   ;;  %v2350_v40 = vld [vmem:[%s2601_s19 + $0x50] ss:$8 sps:$4 sm:$0xff]  }
  0x24   : > { %919 = vmatpush1.bf16.msra.mxu0 %v2305_v7  ;;  %2230 = vmatpush1.bf16.msra.mxu1 %v2305_v7  ;;  %305 = vst.msk [vmem:[#allocation2 + $0x128] sm:$0xff] %vm267_vm0, %v2495_v19  ;;  %306 = vst.msk [vmem:[#allocation2 + $0x130] sm:$0xff] %vm267_vm0, %v2495_v19  ;;  %v2348_v39 = vld [vmem:[%s2601_s19 + $0x154] ss:$8 sps:$4 sm:$0xff]   ;;  %v2351_v41 = vld [vmem:[%s2601_s19 + $0x150] ss:$8 sps:$4 sm:$0xff]  }
  0x25   : > { %920 = vmatprep.subr.bf16.mxu0 %v2494_v1  ;;  %2215 = vmatprep.subr.bf16.mxu1 %v2494_v1  ;;  %307 = vst.msk [vmem:[#allocation2 + $0x138] sm:$0xff] %vm267_vm0, %v2495_v19  ;;  %308 = vst.msk [vmem:[#allocation2 + $0x140] sm:$0xff] %vm267_vm0, %v2495_v19  ;;  %v2352_v42 = vld [vmem:[%s2601_s19 + $0x64] ss:$8 sps:$4 sm:$0xff]   ;;  %v2356_v44 = vld [vmem:[%s2601_s19 + $0x60] ss:$8 sps:$4 sm:$0xff]  }
  0x26   : > { %309 = vst.msk [vmem:[#allocation2 + $0x148] sm:$0xff] %vm267_vm0, %v2495_v19  ;;  %310 = vst.msk [vmem:[#allocation2 + $0x150] sm:$0xff] %vm267_vm0, %v2495_v19  ;;  %v2354_v43 = vld [vmem:[%s2601_s19 + $0x164] ss:$8 sps:$4 sm:$0xff]   ;;  %v2357_v45 = vld [vmem:[%s2601_s19 + $0x160] ss:$8 sps:$4 sm:$0xff]  }
  0x27   : > { %311 = vst.msk [vmem:[#allocation2 + $0x158] sm:$0xff] %vm267_vm0, %v2495_v19  ;;  %312 = vst.msk [vmem:[#allocation2 + $0x160] sm:$0xff] %vm267_vm0, %v2495_v19  ;;  %v2358_v46 = vld [vmem:[%s2601_s19 + $0x74] ss:$8 sps:$4 sm:$0xff]   ;;  %v2362_v48 = vld [vmem:[%s2601_s19 + $0x70] ss:$8 sps:$4 sm:$0xff]  }
  0x28   : > { %921 = vmatpush1.bf16.msra.mxu0 %v2306_v9  ;;  %2231 = vmatpush1.bf16.msra.mxu1 %v2306_v9  ;;  %313 = vst.msk [vmem:[#allocation2 + $0x168] sm:$0xff] %vm267_vm0, %v2495_v19  ;;  %314 = vst.msk [vmem:[#allocation2 + $0x170] sm:$0xff] %vm267_vm0, %v2495_v19  ;;  %v2360_v47 = vld [vmem:[%s2601_s19 + $0x174] ss:$8 sps:$4 sm:$0xff]   ;;  %v2363_v49 = vld [vmem:[%s2601_s19 + $0x170] ss:$8 sps:$4 sm:$0xff]  }
  0x29   : > { %922 = vmatprep.subr.bf16.mxu0 %v2494_v1  ;;  %2216 = vmatprep.subr.bf16.mxu1 %v2494_v1  ;;  %315 = vst.msk [vmem:[#allocation2 + $0x178] sm:$0xff] %vm267_vm0, %v2495_v19  ;;  %316 = vst.msk [vmem:[#allocation2 + $0x180] sm:$0xff] %vm267_vm0, %v2495_v19  ;;  %v2364_v50 = vld [vmem:[%s2601_s19 + $0x84] ss:$8 sps:$4 sm:$0xff]   ;;  %v2368_v52 = vld [vmem:[%s2601_s19 + $0x80] ss:$8 sps:$4 sm:$0xff]  }
  0x2a   : > { %317 = vst.msk [vmem:[#allocation2 + $0x188] sm:$0xff] %vm267_vm0, %v2495_v19  ;;  %318 = vst.msk [vmem:[#allocation2 + $0x190] sm:$0xff] %vm267_vm0, %v2495_v19  ;;  %v2366_v51 = vld [vmem:[%s2601_s19 + $0x184] ss:$8 sps:$4 sm:$0xff]   ;;  %v2369_v53 = vld [vmem:[%s2601_s19 + $0x180] ss:$8 sps:$4 sm:$0xff]  }
  0x2b   : > { %319 = vst.msk [vmem:[#allocation2 + $0x198] sm:$0xff] %vm267_vm0, %v2495_v19  ;;  %320 = vst.msk [vmem:[#allocation2 + $0x1a0] sm:$0xff] %vm267_vm0, %v2495_v19  ;;  %v2370_v54 = vld [vmem:[%s2601_s19 + $0x94] ss:$8 sps:$4 sm:$0xff]   ;;  %v2374_v56 = vld [vmem:[%s2601_s19 + $0x90] ss:$8 sps:$4 sm:$0xff]  }
  0x2c   : > { %923 = vmatpush1.bf16.msra.mxu0 %v2307_v10  ;;  %2232 = vmatpush1.bf16.msra.mxu1 %v2307_v10  ;;  %321 = vst.msk [vmem:[#allocation2 + $0x1a8] sm:$0xff] %vm267_vm0, %v2495_v19  ;;  %322 = vst.msk [vmem:[#allocation2 + $0x1b0] sm:$0xff] %vm267_vm0, %v2495_v19  ;;  %v2372_v55 = vld [vmem:[%s2601_s19 + $0x194] ss:$8 sps:$4 sm:$0xff]   ;;  %v2375_v57 = vld [vmem:[%s2601_s19 + $0x190] ss:$8 sps:$4 sm:$0xff]  }
  0x2d   : > { %924 = vmatprep.subr.bf16.mxu0 %v2494_v1  ;;  %2217 = vmatprep.subr.bf16.mxu1 %v2494_v1  ;;  %323 = vst.msk [vmem:[#allocation2 + $0x1b8] sm:$0xff] %vm267_vm0, %v2495_v19  ;;  %324 = vst.msk [vmem:[#allocation2 + $0x1c0] sm:$0xff] %vm267_vm0, %v2495_v19  ;;  %v2376_v58 = vld [vmem:[%s2601_s19 + $0xa4] ss:$8 sps:$4 sm:$0xff]   ;;  %v2380_v60 = vld [vmem:[%s2601_s19 + $0xa0] ss:$8 sps:$4 sm:$0xff]  }
  0x2e   : > { %325 = vst.msk [vmem:[#allocation2 + $0x1c8] sm:$0xff] %vm267_vm0, %v2495_v19  ;;  %326 = vst.msk [vmem:[#allocation2 + $0x1d0] sm:$0xff] %vm267_vm0, %v2495_v19  ;;  %v2378_v59 = vld [vmem:[%s2601_s19 + $0x1a4] ss:$8 sps:$4 sm:$0xff]   ;;  %v2381_v61 = vld [vmem:[%s2601_s19 + $0x1a0] ss:$8 sps:$4 sm:$0xff]  }
  0x2f   : > { %327 = vst.msk [vmem:[#allocation2 + $0x1d8] sm:$0xff] %vm267_vm0, %v2495_v19  ;;  %328 = vst.msk [vmem:[#allocation2 + $0x1e0] sm:$0xff] %vm267_vm0, %v2495_v19  ;;  %v2382_v62 = vld [vmem:[%s2601_s19 + $0xb4] ss:$8 sps:$4 sm:$0xff]   ;;  %v2386_v0 = vld [vmem:[%s2601_s19 + $0xb0] ss:$8 sps:$4 sm:$0xff]  }
  0x30   : > { %925 = vmatpush1.bf16.msra.mxu0 %v2308_v11  ;;  %2233 = vmatpush1.bf16.msra.mxu1 %v2308_v11  ;;  %329 = vst.msk [vmem:[#allocation2 + $0x1e8] sm:$0xff] %vm267_vm0, %v2495_v19  ;;  %330 = vst.msk [vmem:[#allocation2 + $0x1f0] sm:$0xff] %vm267_vm0, %v2495_v19  ;;  %v2384_v63 = vld [vmem:[%s2601_s19 + $0x1b4] ss:$8 sps:$4 sm:$0xff]   ;;  %v2388_v2 = vld [vmem:[%s2601_s19 + $0xc4] ss:$8 sps:$4 sm:$0xff]  }
  0x31   : > { %926 = vmatprep.subr.bf16.mxu0 %v2494_v1  ;;  %2218 = vmatprep.subr.bf16.mxu1 %v2494_v1  ;;  %331 = vst.msk [vmem:[#allocation2 + $0x1f8] sm:$0xff] %vm267_vm0, %v2495_v19  ;;  %v2390_v3 = vld [vmem:[%s2601_s19 + $0x1c4] ss:$8 sps:$4 sm:$0xff]   ;;  %v2392_v4 = vld [vmem:[%s2601_s19 + $0xc0] ss:$8 sps:$4 sm:$0xff]  }
  0x32   : > { %v2393_v5 = vld [vmem:[%s2601_s19 + $0x1c0] ss:$8 sps:$4 sm:$0xff]   ;;  %v2394_v6 = vld [vmem:[%s2601_s19 + $0xd4] ss:$8 sps:$4 sm:$0xff]   ;;  %v2398_v8 = vld [vmem:[%s2601_s19 + $0xd0] ss:$8 sps:$4 sm:$0xff]  }
  0x33   : > { %v2396_v7 = vld [vmem:[%s2601_s19 + $0x1d4] ss:$8 sps:$4 sm:$0xff]   ;;  %v2399_v9 = vld [vmem:[%s2601_s19 + $0x1d0] ss:$8 sps:$4 sm:$0xff]   ;;  %v2400_v10 = vld [vmem:[%s2601_s19 + $0xe4] ss:$8 sps:$4 sm:$0xff]  }
  0x34   : > { %927 = vmatpush1.bf16.msra.mxu0 %v2309_v12  ;;  %2234 = vmatpush1.bf16.msra.mxu1 %v2309_v12  ;;  %v2402_v11 = vld [vmem:[%s2601_s19 + $0x1e4] ss:$8 sps:$4 sm:$0xff]   ;;  %v2404_v12 = vld [vmem:[%s2601_s19 + $0xe0] ss:$8 sps:$4 sm:$0xff]  }
  0x35   : > { %928 = vmatprep.subr.bf16.mxu0 %v2494_v1  ;;  %2219 = vmatprep.subr.bf16.mxu1 %v2494_v1  ;;  %v364_v19 = vld [vmem:[#allocation2 + $0x100] sm:$0xff] }
  0x38   : > { %929 = vmatpush1.bf16.msra.mxu0 %v2310_v13  ;;  %2235 = vmatpush1.bf16.msra.mxu1 %v2310_v13  ;;  %v2405_v13 = vld [vmem:[%s2601_s19 + $0x1e0] ss:$8 sps:$4 sm:$0xff]  }
  0x39   : > { %930 = vmatprep.subr.bf16.mxu0 %v2494_v1  ;;  %2220 = vmatprep.subr.bf16.mxu1 %v2494_v1 }
  0x3c   : > { %931 = vmatpush1.bf16.msra.mxu0 %v2311_v14  ;;  %2236 = vmatpush1.bf16.msra.mxu1 %v2311_v14  ;;  %v2406_v14 = vld [vmem:[%s2601_s19 + $0xf4] ss:$8 sps:$4 sm:$0xff]  }
  0x3d   : > { %932 = vmatprep.subr.bf16.mxu0 %v2494_v1  ;;  %2221 = vmatprep.subr.bf16.mxu1 %v2494_v1 }
  0x40   : > { %933 = vmatpush1.bf16.msra.mxu0 %v2312_v15  ;;  %2237 = vmatpush1.bf16.msra.mxu1 %v2312_v15  ;;  %v2408_v15 = vld [vmem:[%s2601_s19 + $0x1f4] ss:$8 sps:$4 sm:$0xff]  }
  0x41   : > { %934 = vmatprep.subr.bf16.mxu0 %v2494_v1  ;;  %2222 = vmatprep.subr.bf16.mxu1 %v2494_v1 }
  0x44   : > { %935 = vmatpush1.bf16.msra.mxu0 %v2313_v16  ;;  %2238 = vmatpush1.bf16.msra.mxu1 %v2313_v16  ;;  %v2410_v16 = vld [vmem:[%s2601_s19 + $0xf0] ss:$8 sps:$4 sm:$0xff]  }
  0x45   : > { %936 = vmatprep.subr.bf16.mxu0 %v2494_v1  ;;  %2223 = vmatprep.subr.bf16.mxu1 %v2494_v1 }
  0x48   : > { %937 = vmatpush1.bf16.msra.mxu0 %v2314_v17  ;;  %2239 = vmatpush1.bf16.msra.mxu1 %v2314_v17  ;;  %v2411_v17 = vld [vmem:[%s2601_s19 + $0x1f0] ss:$8 sps:$4 sm:$0xff]  }
  0x49   : > { %938 = vmatprep.subr.bf16.mxu0 %v2494_v1  ;;  %2224 = vmatprep.subr.bf16.mxu1 %v2494_v1  ;;  %v2387_v1 = vld [vmem:[%s2601_s19 + $0x1b0] ss:$8 sps:$4 sm:$0xff]   ;;  %s233_s19 = sand.u32 1, %s2476_s13  }
  0x4a   : > { %s1988_s7 = sshll.u32 %s233_s19, 8  ;;  %s3212_s15 = scalar_lea.sflag [#allocation4], %s233_s19 }
  0x4b   : > { %s2885_s8 = scalar_lea.vmem [#allocation3], %s1988_s7 }
  0x4c   : > { %939 = vmatpush1.bf16.msra.mxu0 %v2660_v18  ;;  %2240 = vmatpush1.bf16.msra.mxu1 %v2660_v18  ;;  %v332_v18 = vld [vmem:[#allocation2] sm:$0xff]  ;;  %s1867_s23 = sshll.u32 %s2885_s8, 4  ;;  %s3200_s23 = int_to_ptr.vmem [resolvable:$true] %s1867_s23 }
  0x4d   : > { %s2414_s29 = scalar_lea.vmem %s3200_s23, 4096  ;;  %p2421_p1 = scmp.lt.s32.totalorder %s3200_s23, %s2419_s4 }
  0x4e   : > { %p2415_p12 = scmp.ne.s32.totalorder %s3200_s23, %s2414_s29  ;;  %p2422_p2 = scmp.lt.s32.totalorder %s2420_s5, %s2414_s29 }
  0x4f   : > { %941 = vmatmul.mubr.bf16.vlgmr.msra.gmra.mrb[0].mxu0 %v2316_v20  ;;  %1069 = vmatmul.mubr.bf16.vlgmr.msra.gmra.mrb[0].mxu1 %v2319_v21 }
  0x50   : > { %948 = vmatprep.mubr.bf16.mxu0 %v2322_v22  ;;  %1076 = vmatprep.mubr.bf16.mxu1 %v2324_v23  ;;  %v333_v22 = vld [vmem:[#allocation2 + $0x8] sm:$0xff]  ;;  %p2416_p13 = pnand %p2415_p12, %p2559_p4  ;;  %p2423_p3 = por %p2422_p2, %p2421_p1 }
  0x51   : > { %v365_v23 = vld [vmem:[#allocation2 + $0x108] sm:$0xff] }
  0x52   : > { %p2417_p0 = pneg %p2416_p13 }
  0x54   : > { %p2424_p5 = pnand %p2423_p3, %p2417_p0 }
  0x57   : > { %949 = vmatmul.mubr.bf16.gmra.mrb[4].mxu0 %v2326_v24  ;;  %1077 = vmatmul.mubr.bf16.gmra.mrb[4].mxu1 %v2327_v25 }
  0x58   : > { %956 = vmatprep.mubr.bf16.mxu0 %v2328_v26  ;;  %1084 = vmatprep.mubr.bf16.mxu1 %v2330_v27 }
  0x5f   : > { %957 = vmatmul.mubr.bf16.gmra.mrb[8].mxu0 %v2332_v28  ;;  %1085 = vmatmul.mubr.bf16.gmra.mrb[8].mxu1 %v2333_v29 }
  0x60   : > { %964 = vmatprep.mubr.bf16.mxu0 %v2334_v30  ;;  %1092 = vmatprep.mubr.bf16.mxu1 %v2336_v31 }
  0x67   : > { %965 = vmatmul.mubr.bf16.gmra.mrb[12].mxu0 %v2338_v32  ;;  %1093 = vmatmul.mubr.bf16.gmra.mrb[12].mxu1 %v2339_v33 }
  0x68   : > { %972 = vmatprep.mubr.bf16.mxu0 %v2340_v34  ;;  %1100 = vmatprep.mubr.bf16.mxu1 %v2342_v35  ;;  %v334_v34 = vld [vmem:[#allocation2 + $0x10] sm:$0xff] }
  0x69   : > { %v366_v35 = vld [vmem:[#allocation2 + $0x110] sm:$0xff] }
  0x6f   : > { %973 = vmatmul.mubr.bf16.gmra.mrb[16].mxu0 %v2344_v36  ;;  %1101 = vmatmul.mubr.bf16.gmra.mrb[16].mxu1 %v2345_v37  ;;  %v2864_v36 = vld [vmem:[%s3260_s2] ss:$0 sm:$0xff] }
  0x70   : > { %980 = vmatprep.mubr.bf16.mxu0 %v2346_v38  ;;  %1108 = vmatprep.mubr.bf16.mxu1 %v2348_v39  ;;  %v335_v39 = vld [vmem:[#allocation2 + $0x18] sm:$0xff] }
  0x77   : > { %981 = vmatmul.mubr.bf16.gmra.mrb[20].mxu0 %v2350_v40  ;;  %1109 = vmatmul.mubr.bf16.gmra.mrb[20].mxu1 %v2351_v41  ;;  %v367_v40 = vld [vmem:[#allocation2 + $0x118] sm:$0xff] }
  0x78   : > { %988 = vmatprep.mubr.bf16.mxu0 %v2352_v42  ;;  %1116 = vmatprep.mubr.bf16.mxu1 %v2354_v43 }
  0x7f   : > { %989 = vmatmul.mubr.bf16.gmra.mrb[24].mxu0 %v2356_v44  ;;  %1117 = vmatmul.mubr.bf16.gmra.mrb[24].mxu1 %v2357_v45 }
  0x80   : > { %996 = vmatprep.mubr.bf16.mxu0 %v2358_v46  ;;  %1124 = vmatprep.mubr.bf16.mxu1 %v2360_v47  ;;  %v2869_v46 = vld [vmem:[%s3260_s2 + $0x1] ss:$0 sm:$0xff] }
  0x87   : > { %997 = vmatmul.mubr.bf16.gmra.mrb[28].mxu0 %v2362_v48  ;;  %1125 = vmatmul.mubr.bf16.gmra.mrb[28].mxu1 %v2363_v49 }
  0x88   : > { %1004 = vmatprep.mubr.bf16.mxu0 %v2364_v50  ;;  %1132 = vmatprep.mubr.bf16.mxu1 %v2366_v51 }
  0x8f   : > { %1005 = vmatmul.mubr.bf16.gmra.mrb[32].mxu0 %v2368_v52  ;;  %1133 = vmatmul.mubr.bf16.gmra.mrb[32].mxu1 %v2369_v53 }
  0x90   : > { %1012 = vmatprep.mubr.bf16.mxu0 %v2370_v54  ;;  %1140 = vmatprep.mubr.bf16.mxu1 %v2372_v55 }
  0x97   : > { %1013 = vmatmul.mubr.bf16.gmra.mrb[36].mxu0 %v2374_v56  ;;  %1141 = vmatmul.mubr.bf16.gmra.mrb[36].mxu1 %v2375_v57 }
  0x98   : > { %1020 = vmatprep.mubr.bf16.mxu0 %v2376_v58  ;;  %1148 = vmatprep.mubr.bf16.mxu1 %v2378_v59 }
  0x9f   : > { %1021 = vmatmul.mubr.bf16.gmra.mrb[40].mxu0 %v2380_v60  ;;  %1149 = vmatmul.mubr.bf16.gmra.mrb[40].mxu1 %v2381_v61 }
  0xa0   : > { %1028 = vmatprep.mubr.bf16.mxu0 %v2382_v62  ;;  %1156 = vmatprep.mubr.bf16.mxu1 %v2384_v63  ;;  %v336_v62 = vld [vmem:[#allocation2 + $0x20] sm:$0xff] }
  0xa1   : > { %v368_v63 = vld [vmem:[#allocation2 + $0x120] sm:$0xff] }
  0xa7   : > { %1029 = vmatmul.mubr.bf16.gmra.mrb[44].mxu0 %v2386_v0  ;;  %1157 = vmatmul.mubr.bf16.gmra.mrb[44].mxu1 %v2387_v1 }
  0xa8   : > { %1036 = vmatprep.mubr.bf16.mxu0 %v2388_v2  ;;  %1164 = vmatprep.mubr.bf16.mxu1 %v2390_v3 }
  0xaf   : > { %1037 = vmatmul.mubr.bf16.gmra.mrb[48].mxu0 %v2392_v4  ;;  %1165 = vmatmul.mubr.bf16.gmra.mrb[48].mxu1 %v2393_v5 }
  0xb0   : > { %1044 = vmatprep.mubr.bf16.mxu0 %v2394_v6  ;;  %1172 = vmatprep.mubr.bf16.mxu1 %v2396_v7  ;;  %v337_v6 = vld [vmem:[#allocation2 + $0x28] sm:$0xff] }
  0xb1   : > { %v369_v7 = vld [vmem:[#allocation2 + $0x128] sm:$0xff] }
  0xb7   : > { %1045 = vmatmul.mubr.bf16.gmra.mrb[52].mxu0 %v2398_v8  ;;  %1173 = vmatmul.mubr.bf16.gmra.mrb[52].mxu1 %v2399_v9 }
  0xb8   : > { %1052 = vmatprep.mubr.bf16.mxu0 %v2400_v10  ;;  %1180 = vmatprep.mubr.bf16.mxu1 %v2402_v11 }
  0xbf   : > { %1053 = vmatmul.mubr.bf16.gmra.mrb[56].mxu0 %v2404_v12  ;;  %1181 = vmatmul.mubr.bf16.gmra.mrb[56].mxu1 %v2405_v13 }
  0xc0   : > { %1060 = vmatprep.mubr.bf16.mxu0 %v2406_v14  ;;  %1188 = vmatprep.mubr.bf16.mxu1 %v2408_v15 }
  0xc7   : > { %1061 = vmatmul.mubr.bf16.gmra.mrb[60].mxu0 %v2410_v16  ;;  %1189 = vmatmul.mubr.bf16.gmra.mrb[60].mxu1 %v2411_v17 }
 0x122   : > { %v942_v20 = vpop.f32.mrb[0].mxu0  ;;  %v1070_v21 = vpop.f32.mrb[0].mxu1 }
 0x123   : > { %v1197_v24 = vadd.f32 %v942_v20, %v332_v18  ;;  %v1229_v25 = vadd.f32 %v1070_v21, %v364_v19  ;;  %v944_v26 = vpop.f32.mrb[1].mxu0  ;;  %v1072_v27 = vpop.f32.mrb[1].mxu1 }
 0x124   : > { %v945_v28 = vpop.f32.mrb[2].mxu0  ;;  %v1073_v29 = vpop.f32.mrb[2].mxu1 }
 0x125   : > { %1262 = vst.msk [vmem:[#allocation2] sm:$0xff] %vm267_vm0, %v1197_v24  ;;  %1294 = vst.msk [vmem:[#allocation2 + $0x100] sm:$0xff] %vm267_vm0, %v1229_v25  ;;  %v1198_v30 = vadd.f32 %v945_v28, %v333_v22  ;;  %v1230_v31 = vadd.f32 %v1073_v29, %v365_v23  ;;  %v947_v32 = vpop.f32.mrb[3].mxu0  ;;  %v1075_v33 = vpop.f32.mrb[3].mxu1 }
 0x127   : > { %1263 = vst.msk [vmem:[#allocation2 + $0x8] sm:$0xff] %vm267_vm0, %v1198_v30  ;;  %1295 = vst.msk [vmem:[#allocation2 + $0x108] sm:$0xff] %vm267_vm0, %v1230_v31  ;;  %v338_v30 = vld [vmem:[#allocation2 + $0x30] sm:$0xff] }
 0x128   : > { %v370_v31 = vld [vmem:[#allocation2 + $0x130] sm:$0xff] }
 0x12a   : > { %v950_v37 = vpop.f32.mrb[4].mxu0  ;;  %v1078_v38 = vpop.f32.mrb[4].mxu1 }
 0x12b   : > { %v1199_v41 = vadd.f32 %v950_v37, %v334_v34  ;;  %v1231_v42 = vadd.f32 %v1078_v38, %v366_v35  ;;  %v952_v43 = vpop.f32.mrb[5].mxu0  ;;  %v1080_v44 = vpop.f32.mrb[5].mxu1 }
 0x12c   : > { %v1329_v45 = vld [vmem:[#allocation2] sm:$0xff]  ;;  %v953_v48 = vpop.f32.mrb[6].mxu0  ;;  %v1081_v49 = vpop.f32.mrb[6].mxu1 }
 0x12d   : > { %v1361_v47 = vld [vmem:[#allocation2 + $0x100] sm:$0xff]  ;;  %v1398_v50 = vmul.f32 %v2864_v36, %v1329_v45  ;;  %1264 = vst.msk [vmem:[#allocation2 + $0x10] sm:$0xff] %vm267_vm0, %v1199_v41  ;;  %1296 = vst.msk [vmem:[#allocation2 + $0x110] sm:$0xff] %vm267_vm0, %v1231_v42  ;;  %v1200_v52 = vadd.f32 %v953_v48, %v335_v39  ;;  %v1232_v53 = vadd.f32 %v1081_v49, %v367_v40  ;;  %v955_v54 = vpop.f32.mrb[7].mxu0  ;;  %v1083_v55 = vpop.f32.mrb[7].mxu1  ;;  %v339_v39 = vld [vmem:[#allocation2 + $0x38] sm:$0xff] }
 0x12e   : > { %v1430_v51 = vmul.f32 %v2864_v36, %v1361_v47  ;;  %v1330_v56 = vld [vmem:[#allocation2 + $0x8] sm:$0xff]  ;;  %v371_v40 = vld [vmem:[#allocation2 + $0x138] sm:$0xff] }
 0x12f   : > { %v1362_v57 = vld [vmem:[#allocation2 + $0x108] sm:$0xff]  ;;  %v1467_v58 = vadd.f32 %v2869_v46, %v1398_v50  ;;  %v1399_v60 = vmul.f32 %v2864_v36, %v1330_v56  ;;  %1265 = vst.msk [vmem:[#allocation2 + $0x18] sm:$0xff] %vm267_vm0, %v1200_v52  ;;  %1297 = vst.msk [vmem:[#allocation2 + $0x118] sm:$0xff] %vm267_vm0, %v1232_v53 }
 0x130   : > { %v1499_v59 = vadd.f32 %v2869_v46, %v1430_v51  ;;  %v1431_v61 = vmul.f32 %v2864_v36, %v1362_v57 }
 0x131   : > { %v2144_v0 = vpack.c.bf16 %v1467_v58, %v1467_v58  ;;  %v1468_v2 = vadd.f32 %v2869_v46, %v1399_v60 }
 0x132   : > { %v2176_v1 = vpack.c.bf16 %v1499_v59, %v1499_v59  ;;  %v1500_v3 = vadd.f32 %v2869_v46, %v1431_v61  ;;  %v958_v4 = vpop.f32.mrb[8].mxu0  ;;  %v1086_v5 = vpop.f32.mrb[8].mxu1 }
 0x133   : > { %1788 = vst.msk [vmem:[%s2885_s8] sm:$0xf] %vm1787_vm1, %v2144_v0  ;;  %v2145_v8 = vpack.c.bf16 %v1468_v2, %v1468_v2  ;;  %v1201_v10 = vadd.f32 %v958_v4, %v336_v62  ;;  %v1233_v11 = vadd.f32 %v1086_v5, %v368_v63  ;;  %v960_v12 = vpop.f32.mrb[9].mxu0  ;;  %v1088_v13 = vpop.f32.mrb[9].mxu1  ;;  %v340_v0 = vld [vmem:[#allocation2 + $0x40] sm:$0xff] }
 0x134   : > { %1820 = vst.msk [vmem:[%s2885_s8 + $0x80] sm:$0xf] %vm1787_vm1, %v2176_v1  ;;  %v2177_v9 = vpack.c.bf16 %v1500_v3, %v1500_v3  ;;  %v1331_v14 = vld [vmem:[#allocation2 + $0x10] sm:$0xff]  ;;  %v961_v16 = vpop.f32.mrb[10].mxu0  ;;  %v1089_v17 = vpop.f32.mrb[10].mxu1  ;;  %v372_v1 = vld [vmem:[#allocation2 + $0x140] sm:$0xff] }
 0x135   : > { %v1363_v15 = vld [vmem:[#allocation2 + $0x110] sm:$0xff]  ;;  %1789 = vst.msk [vmem:[%s2885_s8 + $0x4] sm:$0xf] %vm1787_vm1, %v2145_v8  ;;  %v1400_v18 = vmul.f32 %v2864_v36, %v1331_v14  ;;  %v1202_v20 = vadd.f32 %v961_v16, %v337_v6  ;;  %v1234_v21 = vadd.f32 %v1089_v17, %v369_v7  ;;  %v963_v22 = vpop.f32.mrb[11].mxu0  ;;  %v1091_v23 = vpop.f32.mrb[11].mxu1  ;;  %v341_v8 = vld [vmem:[#allocation2 + $0x48] sm:$0xff] }
 0x136   : > { %1821 = vst.msk [vmem:[%s2885_s8 + $0x84] sm:$0xf] %vm1787_vm1, %v2177_v9  ;;  %v1432_v19 = vmul.f32 %v2864_v36, %v1363_v15  ;;  %v1332_v24 = vld [vmem:[#allocation2 + $0x18] sm:$0xff]  ;;  %v373_v9 = vld [vmem:[#allocation2 + $0x148] sm:$0xff] }
 0x137   : > { %1266 = vst.msk [vmem:[#allocation2 + $0x20] sm:$0xff] %vm267_vm0, %v1201_v10  ;;  %1298 = vst.msk [vmem:[#allocation2 + $0x120] sm:$0xff] %vm267_vm0, %v1233_v11  ;;  %v1364_v25 = vld [vmem:[#allocation2 + $0x118] sm:$0xff]  ;;  %v1469_v26 = vadd.f32 %v2869_v46, %v1400_v18  ;;  %v1401_v28 = vmul.f32 %v2864_v36, %v1332_v24 }
 0x138   : > { %v1501_v27 = vadd.f32 %v2869_v46, %v1432_v19  ;;  %v1433_v29 = vmul.f32 %v2864_v36, %v1364_v25  ;;  %1267 = vst.msk [vmem:[#allocation2 + $0x28] sm:$0xff] %vm267_vm0, %v1202_v20  ;;  %1299 = vst.msk [vmem:[#allocation2 + $0x128] sm:$0xff] %vm267_vm0, %v1234_v21 }
 0x139   : > { %v2146_v32 = vpack.c.bf16 %v1469_v26, %v1469_v26  ;;  %v1470_v34 = vadd.f32 %v2869_v46, %v1401_v28 }
 0x13a   : > { %v2178_v33 = vpack.c.bf16 %v1501_v27, %v1501_v27  ;;  %v1502_v35 = vadd.f32 %v2869_v46, %v1433_v29  ;;  %v966_v37 = vpop.f32.mrb[12].mxu0  ;;  %v1094_v38 = vpop.f32.mrb[12].mxu1 }
 0x13b   : > { %1790 = vst.msk [vmem:[%s2885_s8 + $0x8] sm:$0xf] %vm1787_vm1, %v2146_v32  ;;  %v2147_v41 = vpack.c.bf16 %v1470_v34, %v1470_v34  ;;  %v1203_v43 = vadd.f32 %v966_v37, %v338_v30  ;;  %v1235_v44 = vadd.f32 %v1094_v38, %v370_v31  ;;  %v968_v45 = vpop.f32.mrb[13].mxu0  ;;  %v1096_v47 = vpop.f32.mrb[13].mxu1  ;;  %v342_v32 = vld [vmem:[#allocation2 + $0x50] sm:$0xff] }
 0x13c   : > { %1822 = vst.msk [vmem:[%s2885_s8 + $0x88] sm:$0xf] %vm1787_vm1, %v2178_v33  ;;  %v2179_v42 = vpack.c.bf16 %v1502_v35, %v1502_v35  ;;  %v969_v50 = vpop.f32.mrb[14].mxu0  ;;  %v1097_v51 = vpop.f32.mrb[14].mxu1  ;;  %v374_v33 = vld [vmem:[#allocation2 + $0x150] sm:$0xff] }
 0x13d   : > { %1791 = vst.msk [vmem:[%s2885_s8 + $0xc] sm:$0xf] %vm1787_vm1, %v2147_v41  ;;  %v1204_v54 = vadd.f32 %v969_v50, %v339_v39  ;;  %v1236_v55 = vadd.f32 %v1097_v51, %v371_v40  ;;  %v971_v56 = vpop.f32.mrb[15].mxu0  ;;  %v1099_v57 = vpop.f32.mrb[15].mxu1  ;;  %v343_v41 = vld [vmem:[#allocation2 + $0x58] sm:$0xff] }
 0x13e   : > { %v1333_v48 = vld [vmem:[#allocation2 + $0x20] sm:$0xff]  ;;  %1823 = vst.msk [vmem:[%s2885_s8 + $0x8c] sm:$0xf] %vm1787_vm1, %v2179_v42  ;;  %v375_v42 = vld [vmem:[#allocation2 + $0x158] sm:$0xff] }
 0x13f   : > { %v1365_v49 = vld [vmem:[#allocation2 + $0x120] sm:$0xff]  ;;  %v1402_v52 = vmul.f32 %v2864_v36, %v1333_v48  ;;  %1268 = vst.msk [vmem:[#allocation2 + $0x30] sm:$0xff] %vm267_vm0, %v1203_v43  ;;  %1300 = vst.msk [vmem:[#allocation2 + $0x130] sm:$0xff] %vm267_vm0, %v1235_v44  ;;  %v1334_v58 = vld [vmem:[#allocation2 + $0x28] sm:$0xff] }
 0x140   : > { %v1434_v53 = vmul.f32 %v2864_v36, %v1365_v49  ;;  %v1366_v59 = vld [vmem:[#allocation2 + $0x128] sm:$0xff]  ;;  %v1403_v62 = vmul.f32 %v2864_v36, %v1334_v58  ;;  %1269 = vst.msk [vmem:[#allocation2 + $0x38] sm:$0xff] %vm267_vm0, %v1204_v54  ;;  %1301 = vst.msk [vmem:[#allocation2 + $0x138] sm:$0xff] %vm267_vm0, %v1236_v55 }
 0x141   : > { %v1471_v60 = vadd.f32 %v2869_v46, %v1402_v52  ;;  %v1435_v63 = vmul.f32 %v2864_v36, %v1366_v59 }
 0x142   : > { %v1503_v61 = vadd.f32 %v2869_v46, %v1434_v53  ;;  %v1472_v4 = vadd.f32 %v2869_v46, %v1403_v62  ;;  %v974_v6 = vpop.f32.mrb[16].mxu0  ;;  %v1102_v7 = vpop.f32.mrb[16].mxu1 }
 0x143   : > { %v2148_v2 = vpack.c.bf16 %v1471_v60, %v1471_v60  ;;  %v1504_v5 = vadd.f32 %v2869_v46, %v1435_v63  ;;  %v1205_v12 = vadd.f32 %v974_v6, %v340_v0  ;;  %v1237_v13 = vadd.f32 %v1102_v7, %v372_v1  ;;  %v976_v14 = vpop.f32.mrb[17].mxu0  ;;  %v1104_v15 = vpop.f32.mrb[17].mxu1 }
 0x144   : > { %v2180_v3 = vpack.c.bf16 %v1503_v61, %v1503_v61  ;;  %v2149_v10 = vpack.c.bf16 %v1472_v4, %v1472_v4  ;;  %v977_v18 = vpop.f32.mrb[18].mxu0  ;;  %v1105_v19 = vpop.f32.mrb[18].mxu1 }
 0x145   : > { %1792 = vst.msk [vmem:[%s2885_s8 + $0x10] sm:$0xf] %vm1787_vm1, %v2148_v2  ;;  %v2181_v11 = vpack.c.bf16 %v1504_v5, %v1504_v5  ;;  %v1206_v22 = vadd.f32 %v977_v18, %v341_v8  ;;  %v1238_v23 = vadd.f32 %v1105_v19, %v373_v9  ;;  %v979_v24 = vpop.f32.mrb[19].mxu0  ;;  %v1107_v25 = vpop.f32.mrb[19].mxu1  ;;  %v344_v2 = vld [vmem:[#allocation2 + $0x60] sm:$0xff] }
 0x146   : > { %1824 = vst.msk [vmem:[%s2885_s8 + $0x90] sm:$0xf] %vm1787_vm1, %v2180_v3  ;;  %v1335_v16 = vld [vmem:[#allocation2 + $0x30] sm:$0xff]  ;;  %1793 = vst.msk [vmem:[%s2885_s8 + $0x14] sm:$0xf] %vm1787_vm1, %v2149_v10  ;;  %v376_v3 = vld [vmem:[#allocation2 + $0x160] sm:$0xff] }
 0x147   : > { %v1367_v17 = vld [vmem:[#allocation2 + $0x130] sm:$0xff]  ;;  %1825 = vst.msk [vmem:[%s2885_s8 + $0x94] sm:$0xf] %vm1787_vm1, %v2181_v11  ;;  %v1404_v20 = vmul.f32 %v2864_v36, %v1335_v16  ;;  %v1336_v26 = vld [vmem:[#allocation2 + $0x38] sm:$0xff]  ;;  %v345_v10 = vld [vmem:[#allocation2 + $0x68] sm:$0xff] }
 0x148   : > { %v1436_v21 = vmul.f32 %v2864_v36, %v1367_v17  ;;  %1270 = vst.msk [vmem:[#allocation2 + $0x40] sm:$0xff] %vm267_vm0, %v1205_v12  ;;  %1302 = vst.msk [vmem:[#allocation2 + $0x140] sm:$0xff] %vm267_vm0, %v1237_v13  ;;  %v1368_v27 = vld [vmem:[#allocation2 + $0x138] sm:$0xff]  ;;  %v1405_v30 = vmul.f32 %v2864_v36, %v1336_v26  ;;  %v377_v11 = vld [vmem:[#allocation2 + $0x168] sm:$0xff] }
 0x149   : > { %v1473_v28 = vadd.f32 %v2869_v46, %v1404_v20  ;;  %v1437_v31 = vmul.f32 %v2864_v36, %v1368_v27  ;;  %1271 = vst.msk [vmem:[#allocation2 + $0x48] sm:$0xff] %vm267_vm0, %v1206_v22  ;;  %1303 = vst.msk [vmem:[#allocation2 + $0x148] sm:$0xff] %vm267_vm0, %v1238_v23 }
 0x14a   : > { %v1505_v29 = vadd.f32 %v2869_v46, %v1436_v21  ;;  %v1474_v37 = vadd.f32 %v2869_v46, %v1405_v30  ;;  %v982_v39 = vpop.f32.mrb[20].mxu0  ;;  %v1110_v40 = vpop.f32.mrb[20].mxu1 }
 0x14b   : > { %v2150_v34 = vpack.c.bf16 %v1473_v28, %v1473_v28  ;;  %v1506_v38 = vadd.f32 %v2869_v46, %v1437_v31  ;;  %v1207_v45 = vadd.f32 %v982_v39, %v342_v32  ;;  %v1239_v47 = vadd.f32 %v1110_v40, %v374_v33  ;;  %v984_v48 = vpop.f32.mrb[21].mxu0  ;;  %v1112_v49 = vpop.f32.mrb[21].mxu1 }
 0x14c   : > { %v2182_v35 = vpack.c.bf16 %v1505_v29, %v1505_v29  ;;  %v2151_v43 = vpack.c.bf16 %v1474_v37, %v1474_v37  ;;  %v985_v52 = vpop.f32.mrb[22].mxu0  ;;  %v1113_v53 = vpop.f32.mrb[22].mxu1 }
 0x14d   : > { %1794 = vst.msk [vmem:[%s2885_s8 + $0x18] sm:$0xf] %vm1787_vm1, %v2150_v34  ;;  %v2183_v44 = vpack.c.bf16 %v1506_v38, %v1506_v38  ;;  %v1208_v56 = vadd.f32 %v985_v52, %v343_v41  ;;  %v1240_v57 = vadd.f32 %v1113_v53, %v375_v42  ;;  %v987_v58 = vpop.f32.mrb[23].mxu0  ;;  %v1115_v59 = vpop.f32.mrb[23].mxu1  ;;  %v346_v34 = vld [vmem:[#allocation2 + $0x70] sm:$0xff] }
 0x14e   : > { %1826 = vst.msk [vmem:[%s2885_s8 + $0x98] sm:$0xf] %vm1787_vm1, %v2182_v35  ;;  %1795 = vst.msk [vmem:[%s2885_s8 + $0x1c] sm:$0xf] %vm1787_vm1, %v2151_v43  ;;  %v378_v35 = vld [vmem:[#allocation2 + $0x170] sm:$0xff]  ;;  %v347_v43 = vld [vmem:[#allocation2 + $0x78] sm:$0xff] }
 0x14f   : > { %v1337_v50 = vld [vmem:[#allocation2 + $0x40] sm:$0xff]  ;;  %1827 = vst.msk [vmem:[%s2885_s8 + $0x9c] sm:$0xf] %vm1787_vm1, %v2183_v44  ;;  %v379_v44 = vld [vmem:[#allocation2 + $0x178] sm:$0xff] }
 0x150   : > { %v1369_v51 = vld [vmem:[#allocation2 + $0x140] sm:$0xff]  ;;  %v1406_v54 = vmul.f32 %v2864_v36, %v1337_v50  ;;  %1272 = vst.msk [vmem:[#allocation2 + $0x50] sm:$0xff] %vm267_vm0, %v1207_v45  ;;  %1304 = vst.msk [vmem:[#allocation2 + $0x150] sm:$0xff] %vm267_vm0, %v1239_v47  ;;  %v1338_v60 = vld [vmem:[#allocation2 + $0x48] sm:$0xff] }
 0x151   : > { %v1438_v55 = vmul.f32 %v2864_v36, %v1369_v51  ;;  %v1370_v61 = vld [vmem:[#allocation2 + $0x148] sm:$0xff]  ;;  %v1407_v0 = vmul.f32 %v2864_v36, %v1338_v60  ;;  %1273 = vst.msk [vmem:[#allocation2 + $0x58] sm:$0xff] %vm267_vm0, %v1208_v56  ;;  %1305 = vst.msk [vmem:[#allocation2 + $0x158] sm:$0xff] %vm267_vm0, %v1240_v57 }
 0x152   : > { %v1475_v62 = vadd.f32 %v2869_v46, %v1406_v54  ;;  %v1439_v1 = vmul.f32 %v2864_v36, %v1370_v61  ;;  %v990_v8 = vpop.f32.mrb[24].mxu0  ;;  %v1118_v9 = vpop.f32.mrb[24].mxu1 }
 0x153   : > { %v1507_v63 = vadd.f32 %v2869_v46, %v1438_v55  ;;  %v1476_v6 = vadd.f32 %v2869_v46, %v1407_v0  ;;  %v1209_v14 = vadd.f32 %v990_v8, %v344_v2  ;;  %v1241_v15 = vadd.f32 %v1118_v9, %v376_v3  ;;  %v992_v16 = vpop.f32.mrb[25].mxu0  ;;  %v1120_v17 = vpop.f32.mrb[25].mxu1 }
 0x154   : > { %v2152_v4 = vpack.c.bf16 %v1475_v62, %v1475_v62  ;;  %v1508_v7 = vadd.f32 %v2869_v46, %v1439_v1  ;;  %v993_v20 = vpop.f32.mrb[26].mxu0  ;;  %v1121_v21 = vpop.f32.mrb[26].mxu1 }
 0x155   : > { %v2184_v5 = vpack.c.bf16 %v1507_v63, %v1507_v63  ;;  %v2153_v12 = vpack.c.bf16 %v1476_v6, %v1476_v6  ;;  %1274 = vst.msk [vmem:[#allocation2 + $0x60] sm:$0xff] %vm267_vm0, %v1209_v14  ;;  %1306 = vst.msk [vmem:[#allocation2 + $0x160] sm:$0xff] %vm267_vm0, %v1241_v15  ;;  %v1210_v24 = vadd.f32 %v993_v20, %v345_v10  ;;  %v995_v26 = vpop.f32.mrb[27].mxu0  ;;  %v1123_v27 = vpop.f32.mrb[27].mxu1 }
 0x156   : > { %1796 = vst.msk [vmem:[%s2885_s8 + $0x20] sm:$0xf] %vm1787_vm1, %v2152_v4  ;;  %v2185_v13 = vpack.c.bf16 %v1508_v7, %v1508_v7  ;;  %v1242_v25 = vadd.f32 %v1121_v21, %v377_v11  ;;  %v348_v4 = vld [vmem:[#allocation2 + $0x80] sm:$0xff] }
 0x157   : > { %1828 = vst.msk [vmem:[%s2885_s8 + $0xa0] sm:$0xf] %vm1787_vm1, %v2184_v5  ;;  %v1339_v18 = vld [vmem:[#allocation2 + $0x50] sm:$0xff]  ;;  %1797 = vst.msk [vmem:[%s2885_s8 + $0x24] sm:$0xf] %vm1787_vm1, %v2153_v12  ;;  %v380_v5 = vld [vmem:[#allocation2 + $0x180] sm:$0xff] }
 0x158   : > { %v1371_v19 = vld [vmem:[#allocation2 + $0x150] sm:$0xff]  ;;  %1829 = vst.msk [vmem:[%s2885_s8 + $0xa4] sm:$0xf] %vm1787_vm1, %v2185_v13  ;;  %v1408_v22 = vmul.f32 %v2864_v36, %v1339_v18  ;;  %v1340_v28 = vld [vmem:[#allocation2 + $0x58] sm:$0xff]  ;;  %v349_v12 = vld [vmem:[#allocation2 + $0x88] sm:$0xff] }
 0x159   : > { %v1440_v23 = vmul.f32 %v2864_v36, %v1371_v19  ;;  %v1372_v29 = vld [vmem:[#allocation2 + $0x158] sm:$0xff]  ;;  %v1409_v32 = vmul.f32 %v2864_v36, %v1340_v28  ;;  %1275 = vst.msk [vmem:[#allocation2 + $0x68] sm:$0xff] %vm267_vm0, %v1210_v24  ;;  %1307 = vst.msk [vmem:[#allocation2 + $0x168] sm:$0xff] %vm267_vm0, %v1242_v25  ;;  %v381_v13 = vld [vmem:[#allocation2 + $0x188] sm:$0xff] }
 0x15a   : > { %v1477_v30 = vadd.f32 %v2869_v46, %v1408_v22  ;;  %v1441_v33 = vmul.f32 %v2864_v36, %v1372_v29  ;;  %v998_v41 = vpop.f32.mrb[28].mxu0  ;;  %v1126_v42 = vpop.f32.mrb[28].mxu1 }
 0x15b   : > { %v1509_v31 = vadd.f32 %v2869_v46, %v1440_v23  ;;  %v1478_v39 = vadd.f32 %v2869_v46, %v1409_v32  ;;  %v1211_v48 = vadd.f32 %v998_v41, %v346_v34  ;;  %v1243_v49 = vadd.f32 %v1126_v42, %v378_v35  ;;  %v1000_v50 = vpop.f32.mrb[29].mxu0  ;;  %v1128_v51 = vpop.f32.mrb[29].mxu1 }
 0x15c   : > { %v2154_v37 = vpack.c.bf16 %v1477_v30, %v1477_v30  ;;  %v1510_v40 = vadd.f32 %v2869_v46, %v1441_v33  ;;  %v1341_v52 = vld [vmem:[#allocation2 + $0x60] sm:$0xff]  ;;  %v1001_v54 = vpop.f32.mrb[30].mxu0  ;;  %v1129_v55 = vpop.f32.mrb[30].mxu1 }
 0x15d   : > { %v2186_v38 = vpack.c.bf16 %v1509_v31, %v1509_v31  ;;  %v2155_v45 = vpack.c.bf16 %v1478_v39, %v1478_v39  ;;  %v1373_v53 = vld [vmem:[#allocation2 + $0x160] sm:$0xff]  ;;  %v1410_v56 = vmul.f32 %v2864_v36, %v1341_v52  ;;  %1276 = vst.msk [vmem:[#allocation2 + $0x70] sm:$0xff] %vm267_vm0, %v1211_v48  ;;  %1308 = vst.msk [vmem:[#allocation2 + $0x170] sm:$0xff] %vm267_vm0, %v1243_v49  ;;  %v1003_v60 = vpop.f32.mrb[31].mxu0  ;;  %v1131_v61 = vpop.f32.mrb[31].mxu1 }
 0x15e   : > { %1798 = vst.msk [vmem:[%s2885_s8 + $0x28] sm:$0xf] %vm1787_vm1, %v2154_v37  ;;  %v2187_v47 = vpack.c.bf16 %v1510_v40, %v1510_v40  ;;  %v1442_v57 = vmul.f32 %v2864_v36, %v1373_v53  ;;  %v1212_v58 = vadd.f32 %v1001_v54, %v347_v43  ;;  %v1244_v59 = vadd.f32 %v1129_v55, %v379_v44  ;;  %v350_v37 = vld [vmem:[#allocation2 + $0x90] sm:$0xff] }
 0x15f   : > { %1830 = vst.msk [vmem:[%s2885_s8 + $0xa8] sm:$0xf] %vm1787_vm1, %v2186_v38  ;;  %1799 = vst.msk [vmem:[%s2885_s8 + $0x2c] sm:$0xf] %vm1787_vm1, %v2155_v45  ;;  %v1479_v0 = vadd.f32 %v2869_v46, %v1410_v56  ;;  %v382_v38 = vld [vmem:[#allocation2 + $0x190] sm:$0xff]  ;;  %v351_v45 = vld [vmem:[#allocation2 + $0x98] sm:$0xff] }
 0x160   : > { %1831 = vst.msk [vmem:[%s2885_s8 + $0xac] sm:$0xf] %vm1787_vm1, %v2187_v47  ;;  %v1342_v62 = vld [vmem:[#allocation2 + $0x68] sm:$0xff]  ;;  %v1511_v1 = vadd.f32 %v2869_v46, %v1442_v57  ;;  %v383_v47 = vld [vmem:[#allocation2 + $0x198] sm:$0xff] }
 0x161   : > { %v1374_v63 = vld [vmem:[#allocation2 + $0x168] sm:$0xff]  ;;  %v1411_v2 = vmul.f32 %v2864_v36, %v1342_v62  ;;  %1277 = vst.msk [vmem:[#allocation2 + $0x78] sm:$0xff] %vm267_vm0, %v1212_v58  ;;  %1309 = vst.msk [vmem:[#allocation2 + $0x178] sm:$0xff] %vm267_vm0, %v1244_v59  ;;  %v2156_v6 = vpack.c.bf16 %v1479_v0, %v1479_v0 }
 0x162   : > { %v1443_v3 = vmul.f32 %v2864_v36, %v1374_v63  ;;  %v2188_v7 = vpack.c.bf16 %v1511_v1, %v1511_v1  ;;  %v1006_v10 = vpop.f32.mrb[32].mxu0  ;;  %v1134_v11 = vpop.f32.mrb[32].mxu1 }
 0x163   : > { %v1480_v8 = vadd.f32 %v2869_v46, %v1411_v2  ;;  %1800 = vst.msk [vmem:[%s2885_s8 + $0x30] sm:$0xf] %vm1787_vm1, %v2156_v6  ;;  %v1213_v16 = vadd.f32 %v1006_v10, %v348_v4  ;;  %v1245_v17 = vadd.f32 %v1134_v11, %v380_v5  ;;  %v1008_v18 = vpop.f32.mrb[33].mxu0  ;;  %v1136_v19 = vpop.f32.mrb[33].mxu1  ;;  %v352_v6 = vld [vmem:[#allocation2 + $0xa0] sm:$0xff] }
 0x164   : > { %v1512_v9 = vadd.f32 %v2869_v46, %v1443_v3  ;;  %1832 = vst.msk [vmem:[%s2885_s8 + $0xb0] sm:$0xf] %vm1787_vm1, %v2188_v7  ;;  %v1343_v20 = vld [vmem:[#allocation2 + $0x70] sm:$0xff]  ;;  %v1009_v22 = vpop.f32.mrb[34].mxu0  ;;  %v1137_v23 = vpop.f32.mrb[34].mxu1  ;;  %v384_v7 = vld [vmem:[#allocation2 + $0x1a0] sm:$0xff] }
 0x165   : > { %v2157_v14 = vpack.c.bf16 %v1480_v8, %v1480_v8  ;;  %v1375_v21 = vld [vmem:[#allocation2 + $0x170] sm:$0xff]  ;;  %v1412_v24 = vmul.f32 %v2864_v36, %v1343_v20  ;;  %1278 = vst.msk [vmem:[#allocation2 + $0x80] sm:$0xff] %vm267_vm0, %v1213_v16  ;;  %1310 = vst.msk [vmem:[#allocation2 + $0x180] sm:$0xff] %vm267_vm0, %v1245_v17  ;;  %v1214_v26 = vadd.f32 %v1009_v22, %v349_v12  ;;  %v1011_v28 = vpop.f32.mrb[35].mxu0  ;;  %v1139_v29 = vpop.f32.mrb[35].mxu1 }
 0x166   : > { %v2189_v15 = vpack.c.bf16 %v1512_v9, %v1512_v9  ;;  %v1444_v25 = vmul.f32 %v2864_v36, %v1375_v21  ;;  %v1246_v27 = vadd.f32 %v1137_v23, %v381_v13 }
 0x167   : > { %1801 = vst.msk [vmem:[%s2885_s8 + $0x34] sm:$0xf] %vm1787_vm1, %v2157_v14  ;;  %v1481_v32 = vadd.f32 %v2869_v46, %v1412_v24  ;;  %v353_v14 = vld [vmem:[#allocation2 + $0xa8] sm:$0xff] }
 0x168   : > { %1833 = vst.msk [vmem:[%s2885_s8 + $0xb4] sm:$0xf] %vm1787_vm1, %v2189_v15  ;;  %v1344_v30 = vld [vmem:[#allocation2 + $0x78] sm:$0xff]  ;;  %v1513_v33 = vadd.f32 %v2869_v46, %v1444_v25  ;;  %v385_v15 = vld [vmem:[#allocation2 + $0x1a8] sm:$0xff] }
 0x169   : > { %v1376_v31 = vld [vmem:[#allocation2 + $0x178] sm:$0xff]  ;;  %v1413_v34 = vmul.f32 %v2864_v36, %v1344_v30  ;;  %1279 = vst.msk [vmem:[#allocation2 + $0x88] sm:$0xff] %vm267_vm0, %v1214_v26  ;;  %1311 = vst.msk [vmem:[#allocation2 + $0x188] sm:$0xff] %vm267_vm0, %v1246_v27  ;;  %v2158_v39 = vpack.c.bf16 %v1481_v32, %v1481_v32 }
 0x16a   : > { %v1445_v35 = vmul.f32 %v2864_v36, %v1376_v31  ;;  %v2190_v40 = vpack.c.bf16 %v1513_v33, %v1513_v33  ;;  %v1014_v43 = vpop.f32.mrb[36].mxu0  ;;  %v1142_v44 = vpop.f32.mrb[36].mxu1 }
 0x16b   : > { %v1482_v41 = vadd.f32 %v2869_v46, %v1413_v34  ;;  %1802 = vst.msk [vmem:[%s2885_s8 + $0x38] sm:$0xf] %vm1787_vm1, %v2158_v39  ;;  %v1215_v50 = vadd.f32 %v1014_v43, %v350_v37  ;;  %v1247_v51 = vadd.f32 %v1142_v44, %v382_v38  ;;  %v1016_v52 = vpop.f32.mrb[37].mxu0  ;;  %v1144_v53 = vpop.f32.mrb[37].mxu1  ;;  %v354_v39 = vld [vmem:[#allocation2 + $0xb0] sm:$0xff] }
 0x16c   : > { %v1514_v42 = vadd.f32 %v2869_v46, %v1445_v35  ;;  %1834 = vst.msk [vmem:[%s2885_s8 + $0xb8] sm:$0xf] %vm1787_vm1, %v2190_v40  ;;  %v1345_v54 = vld [vmem:[#allocation2 + $0x80] sm:$0xff]  ;;  %v1017_v56 = vpop.f32.mrb[38].mxu0  ;;  %v1145_v57 = vpop.f32.mrb[38].mxu1  ;;  %v386_v40 = vld [vmem:[#allocation2 + $0x1b0] sm:$0xff] }
 0x16d   : > { %v2159_v48 = vpack.c.bf16 %v1482_v41, %v1482_v41  ;;  %v1377_v55 = vld [vmem:[#allocation2 + $0x180] sm:$0xff]  ;;  %v1414_v58 = vmul.f32 %v2864_v36, %v1345_v54  ;;  %1280 = vst.msk [vmem:[#allocation2 + $0x90] sm:$0xff] %vm267_vm0, %v1215_v50  ;;  %1312 = vst.msk [vmem:[#allocation2 + $0x190] sm:$0xff] %vm267_vm0, %v1247_v51  ;;  %v1216_v60 = vadd.f32 %v1017_v56, %v351_v45  ;;  %v1019_v62 = vpop.f32.mrb[39].mxu0  ;;  %v1147_v63 = vpop.f32.mrb[39].mxu1 }
 0x16e   : > { %v2191_v49 = vpack.c.bf16 %v1514_v42, %v1514_v42  ;;  %v1446_v59 = vmul.f32 %v2864_v36, %v1377_v55  ;;  %v1248_v61 = vadd.f32 %v1145_v57, %v383_v47 }
 0x16f   : > { %1803 = vst.msk [vmem:[%s2885_s8 + $0x3c] sm:$0xf] %vm1787_vm1, %v2159_v48  ;;  %v1483_v2 = vadd.f32 %v2869_v46, %v1414_v58  ;;  %v355_v48 = vld [vmem:[#allocation2 + $0xb8] sm:$0xff] }
 0x170   : > { %1835 = vst.msk [vmem:[%s2885_s8 + $0xbc] sm:$0xf] %vm1787_vm1, %v2191_v49  ;;  %v1346_v0 = vld [vmem:[#allocation2 + $0x88] sm:$0xff]  ;;  %v1515_v3 = vadd.f32 %v2869_v46, %v1446_v59  ;;  %v387_v49 = vld [vmem:[#allocation2 + $0x1b8] sm:$0xff] }
 0x171   : > { %v1378_v1 = vld [vmem:[#allocation2 + $0x188] sm:$0xff]  ;;  %v1415_v4 = vmul.f32 %v2864_v36, %v1346_v0  ;;  %1281 = vst.msk [vmem:[#allocation2 + $0x98] sm:$0xff] %vm267_vm0, %v1216_v60  ;;  %1313 = vst.msk [vmem:[#allocation2 + $0x198] sm:$0xff] %vm267_vm0, %v1248_v61  ;;  %v2160_v8 = vpack.c.bf16 %v1483_v2, %v1483_v2 }
 0x172   : > { %v1447_v5 = vmul.f32 %v2864_v36, %v1378_v1  ;;  %v2192_v9 = vpack.c.bf16 %v1515_v3, %v1515_v3  ;;  %v1022_v12 = vpop.f32.mrb[40].mxu0  ;;  %v1150_v13 = vpop.f32.mrb[40].mxu1 }
 0x173   : > { %v1484_v10 = vadd.f32 %v2869_v46, %v1415_v4  ;;  %1804 = vst.msk [vmem:[%s2885_s8 + $0x40] sm:$0xf] %vm1787_vm1, %v2160_v8  ;;  %v1217_v18 = vadd.f32 %v1022_v12, %v352_v6  ;;  %v1249_v19 = vadd.f32 %v1150_v13, %v384_v7  ;;  %v1024_v20 = vpop.f32.mrb[41].mxu0  ;;  %v1152_v21 = vpop.f32.mrb[41].mxu1  ;;  %v356_v8 = vld [vmem:[#allocation2 + $0xc0] sm:$0xff] }
 0x174   : > { %v1516_v11 = vadd.f32 %v2869_v46, %v1447_v5  ;;  %1836 = vst.msk [vmem:[%s2885_s8 + $0xc0] sm:$0xf] %vm1787_vm1, %v2192_v9  ;;  %v1347_v22 = vld [vmem:[#allocation2 + $0x90] sm:$0xff]  ;;  %v1025_v24 = vpop.f32.mrb[42].mxu0  ;;  %v1153_v25 = vpop.f32.mrb[42].mxu1  ;;  %v388_v9 = vld [vmem:[#allocation2 + $0x1c0] sm:$0xff] }
 0x175   : > { %v2161_v16 = vpack.c.bf16 %v1484_v10, %v1484_v10  ;;  %v1379_v23 = vld [vmem:[#allocation2 + $0x190] sm:$0xff]  ;;  %v1416_v26 = vmul.f32 %v2864_v36, %v1347_v22  ;;  %1282 = vst.msk [vmem:[#allocation2 + $0xa0] sm:$0xff] %vm267_vm0, %v1217_v18  ;;  %1314 = vst.msk [vmem:[#allocation2 + $0x1a0] sm:$0xff] %vm267_vm0, %v1249_v19  ;;  %v1218_v28 = vadd.f32 %v1025_v24, %v353_v14  ;;  %v1027_v30 = vpop.f32.mrb[43].mxu0  ;;  %v1155_v31 = vpop.f32.mrb[43].mxu1 }
 0x176   : > { %v2193_v17 = vpack.c.bf16 %v1516_v11, %v1516_v11  ;;  %v1448_v27 = vmul.f32 %v2864_v36, %v1379_v23  ;;  %v1250_v29 = vadd.f32 %v1153_v25, %v385_v15 }
 0x177   : > { %1805 = vst.msk [vmem:[%s2885_s8 + $0x44] sm:$0xf] %vm1787_vm1, %v2161_v16  ;;  %v1485_v34 = vadd.f32 %v2869_v46, %v1416_v26  ;;  %v357_v16 = vld [vmem:[#allocation2 + $0xc8] sm:$0xff] }
 0x178   : > { %1837 = vst.msk [vmem:[%s2885_s8 + $0xc4] sm:$0xf] %vm1787_vm1, %v2193_v17  ;;  %v1348_v32 = vld [vmem:[#allocation2 + $0x98] sm:$0xff]  ;;  %v1517_v35 = vadd.f32 %v2869_v46, %v1448_v27  ;;  %v389_v17 = vld [vmem:[#allocation2 + $0x1c8] sm:$0xff] }
 0x179   : > { %v1380_v33 = vld [vmem:[#allocation2 + $0x198] sm:$0xff]  ;;  %v1417_v37 = vmul.f32 %v2864_v36, %v1348_v32  ;;  %1283 = vst.msk [vmem:[#allocation2 + $0xa8] sm:$0xff] %vm267_vm0, %v1218_v28  ;;  %1315 = vst.msk [vmem:[#allocation2 + $0x1a8] sm:$0xff] %vm267_vm0, %v1250_v29  ;;  %v2162_v41 = vpack.c.bf16 %v1485_v34, %v1485_v34 }
 0x17a   : > { %v1449_v38 = vmul.f32 %v2864_v36, %v1380_v33  ;;  %v2194_v42 = vpack.c.bf16 %v1517_v35, %v1517_v35  ;;  %v1030_v45 = vpop.f32.mrb[44].mxu0  ;;  %v1158_v47 = vpop.f32.mrb[44].mxu1 }
 0x17b   : > { %v1486_v43 = vadd.f32 %v2869_v46, %v1417_v37  ;;  %1806 = vst.msk [vmem:[%s2885_s8 + $0x48] sm:$0xf] %vm1787_vm1, %v2162_v41  ;;  %v1219_v52 = vadd.f32 %v1030_v45, %v354_v39  ;;  %v1251_v53 = vadd.f32 %v1158_v47, %v386_v40  ;;  %v1032_v54 = vpop.f32.mrb[45].mxu0  ;;  %v1160_v55 = vpop.f32.mrb[45].mxu1  ;;  %v358_v41 = vld [vmem:[#allocation2 + $0xd0] sm:$0xff] }
 0x17c   : > { %v1518_v44 = vadd.f32 %v2869_v46, %v1449_v38  ;;  %1838 = vst.msk [vmem:[%s2885_s8 + $0xc8] sm:$0xf] %vm1787_vm1, %v2194_v42  ;;  %v1349_v56 = vld [vmem:[#allocation2 + $0xa0] sm:$0xff]  ;;  %v1033_v58 = vpop.f32.mrb[46].mxu0  ;;  %v1161_v59 = vpop.f32.mrb[46].mxu1  ;;  %v390_v42 = vld [vmem:[#allocation2 + $0x1d0] sm:$0xff] }
 0x17d   : > { %v2163_v50 = vpack.c.bf16 %v1486_v43, %v1486_v43  ;;  %v1381_v57 = vld [vmem:[#allocation2 + $0x1a0] sm:$0xff]  ;;  %v1418_v60 = vmul.f32 %v2864_v36, %v1349_v56  ;;  %1284 = vst.msk [vmem:[#allocation2 + $0xb0] sm:$0xff] %vm267_vm0, %v1219_v52  ;;  %1316 = vst.msk [vmem:[#allocation2 + $0x1b0] sm:$0xff] %vm267_vm0, %v1251_v53  ;;  %v1220_v62 = vadd.f32 %v1033_v58, %v355_v48  ;;  %v1035_v0 = vpop.f32.mrb[47].mxu0  ;;  %v1163_v1 = vpop.f32.mrb[47].mxu1 }
 0x17e   : > { %v2195_v51 = vpack.c.bf16 %v1518_v44, %v1518_v44  ;;  %v1450_v61 = vmul.f32 %v2864_v36, %v1381_v57  ;;  %v1252_v63 = vadd.f32 %v1161_v59, %v387_v49 }
 0x17f   : > { %1807 = vst.msk [vmem:[%s2885_s8 + $0x4c] sm:$0xf] %vm1787_vm1, %v2163_v50  ;;  %v1487_v4 = vadd.f32 %v2869_v46, %v1418_v60  ;;  %v359_v50 = vld [vmem:[#allocation2 + $0xd8] sm:$0xff] }
 0x180   : > { %1839 = vst.msk [vmem:[%s2885_s8 + $0xcc] sm:$0xf] %vm1787_vm1, %v2195_v51  ;;  %v1350_v2 = vld [vmem:[#allocation2 + $0xa8] sm:$0xff]  ;;  %v1519_v5 = vadd.f32 %v2869_v46, %v1450_v61  ;;  %v391_v51 = vld [vmem:[#allocation2 + $0x1d8] sm:$0xff] }
 0x181   : > { %v1382_v3 = vld [vmem:[#allocation2 + $0x1a8] sm:$0xff]  ;;  %v1419_v6 = vmul.f32 %v2864_v36, %v1350_v2  ;;  %1285 = vst.msk [vmem:[#allocation2 + $0xb8] sm:$0xff] %vm267_vm0, %v1220_v62  ;;  %1317 = vst.msk [vmem:[#allocation2 + $0x1b8] sm:$0xff] %vm267_vm0, %v1252_v63  ;;  %v2164_v10 = vpack.c.bf16 %v1487_v4, %v1487_v4 }
 0x182   : > { %v1451_v7 = vmul.f32 %v2864_v36, %v1382_v3  ;;  %v2196_v11 = vpack.c.bf16 %v1519_v5, %v1519_v5  ;;  %v1038_v14 = vpop.f32.mrb[48].mxu0  ;;  %v1166_v15 = vpop.f32.mrb[48].mxu1 }
 0x183   : > { %v1488_v12 = vadd.f32 %v2869_v46, %v1419_v6  ;;  %1808 = vst.msk [vmem:[%s2885_s8 + $0x50] sm:$0xf] %vm1787_vm1, %v2164_v10  ;;  %v1221_v20 = vadd.f32 %v1038_v14, %v356_v8  ;;  %v1253_v21 = vadd.f32 %v1166_v15, %v388_v9  ;;  %v1040_v22 = vpop.f32.mrb[49].mxu0  ;;  %v1168_v23 = vpop.f32.mrb[49].mxu1  ;;  %v360_v10 = vld [vmem:[#allocation2 + $0xe0] sm:$0xff] }
 0x184   : > { %v1520_v13 = vadd.f32 %v2869_v46, %v1451_v7  ;;  %1840 = vst.msk [vmem:[%s2885_s8 + $0xd0] sm:$0xf] %vm1787_vm1, %v2196_v11  ;;  %v1351_v24 = vld [vmem:[#allocation2 + $0xb0] sm:$0xff]  ;;  %v1041_v26 = vpop.f32.mrb[50].mxu0  ;;  %v1169_v27 = vpop.f32.mrb[50].mxu1  ;;  %v392_v11 = vld [vmem:[#allocation2 + $0x1e0] sm:$0xff] }
 0x185   : > { %v2165_v18 = vpack.c.bf16 %v1488_v12, %v1488_v12  ;;  %v1383_v25 = vld [vmem:[#allocation2 + $0x1b0] sm:$0xff]  ;;  %v1420_v28 = vmul.f32 %v2864_v36, %v1351_v24  ;;  %1286 = vst.msk [vmem:[#allocation2 + $0xc0] sm:$0xff] %vm267_vm0, %v1221_v20  ;;  %1318 = vst.msk [vmem:[#allocation2 + $0x1c0] sm:$0xff] %vm267_vm0, %v1253_v21  ;;  %v1222_v30 = vadd.f32 %v1041_v26, %v357_v16  ;;  %v1043_v32 = vpop.f32.mrb[51].mxu0  ;;  %v1171_v33 = vpop.f32.mrb[51].mxu1 }
 0x186   : > { %v2197_v19 = vpack.c.bf16 %v1520_v13, %v1520_v13  ;;  %v1452_v29 = vmul.f32 %v2864_v36, %v1383_v25  ;;  %v1254_v31 = vadd.f32 %v1169_v27, %v389_v17 }
 0x187   : > { %1809 = vst.msk [vmem:[%s2885_s8 + $0x54] sm:$0xf] %vm1787_vm1, %v2165_v18  ;;  %v1489_v37 = vadd.f32 %v2869_v46, %v1420_v28  ;;  %v361_v18 = vld [vmem:[#allocation2 + $0xe8] sm:$0xff]  ;;  %v3138_v28 = vld [vmem:[%s3260_s2] ss:$0 sm:$0xff] }
 0x188   : > { %1841 = vst.msk [vmem:[%s2885_s8 + $0xd4] sm:$0xf] %vm1787_vm1, %v2197_v19  ;;  %v1352_v34 = vld [vmem:[#allocation2 + $0xb8] sm:$0xff]  ;;  %v1521_v38 = vadd.f32 %v2869_v46, %v1452_v29  ;;  %v393_v19 = vld [vmem:[#allocation2 + $0x1e8] sm:$0xff] }
 0x189   : > { %v1384_v35 = vld [vmem:[#allocation2 + $0x1b8] sm:$0xff]  ;;  %v1421_v39 = vmul.f32 %v2864_v36, %v1352_v34  ;;  %1287 = vst.msk [vmem:[#allocation2 + $0xc8] sm:$0xff] %vm267_vm0, %v1222_v30  ;;  %1319 = vst.msk [vmem:[#allocation2 + $0x1c8] sm:$0xff] %vm267_vm0, %v1254_v31  ;;  %v2166_v43 = vpack.c.bf16 %v1489_v37, %v1489_v37 }
 0x18a   : > { %v1453_v40 = vmul.f32 %v2864_v36, %v1384_v35  ;;  %v2198_v44 = vpack.c.bf16 %v1521_v38, %v1521_v38  ;;  %v1046_v48 = vpop.f32.mrb[52].mxu0  ;;  %v1174_v49 = vpop.f32.mrb[52].mxu1  ;;  %v3147_v38 = vld [vmem:[%s3260_s2 + $0x1] ss:$0 sm:$0xff] }
 0x18b   : > { %v1490_v45 = vadd.f32 %v2869_v46, %v1421_v39  ;;  %1810 = vst.msk [vmem:[%s2885_s8 + $0x58] sm:$0xf] %vm1787_vm1, %v2166_v43  ;;  %v1223_v54 = vadd.f32 %v1046_v48, %v358_v41  ;;  %v1255_v55 = vadd.f32 %v1174_v49, %v390_v42  ;;  %v1048_v56 = vpop.f32.mrb[53].mxu0  ;;  %v1176_v57 = vpop.f32.mrb[53].mxu1  ;;  %v362_v43 = vld [vmem:[#allocation2 + $0xf0] sm:$0xff] }
 0x18c   : > { %v1522_v47 = vadd.f32 %v2869_v46, %v1453_v40  ;;  %1842 = vst.msk [vmem:[%s2885_s8 + $0xd8] sm:$0xf] %vm1787_vm1, %v2198_v44  ;;  %v1353_v58 = vld [vmem:[#allocation2 + $0xc0] sm:$0xff]  ;;  %v1049_v60 = vpop.f32.mrb[54].mxu0  ;;  %v1177_v61 = vpop.f32.mrb[54].mxu1  ;;  %v394_v44 = vld [vmem:[#allocation2 + $0x1f0] sm:$0xff] }
 0x18d   : > { %v2167_v52 = vpack.c.bf16 %v1490_v45, %v1490_v45  ;;  %v1385_v59 = vld [vmem:[#allocation2 + $0x1c0] sm:$0xff]  ;;  %v1422_v62 = vmul.f32 %v2864_v36, %v1353_v58  ;;  %1288 = vst.msk [vmem:[#allocation2 + $0xd0] sm:$0xff] %vm267_vm0, %v1223_v54  ;;  %1320 = vst.msk [vmem:[#allocation2 + $0x1d0] sm:$0xff] %vm267_vm0, %v1255_v55  ;;  %v1224_v0 = vadd.f32 %v1049_v60, %v359_v50  ;;  %v1051_v2 = vpop.f32.mrb[55].mxu0  ;;  %v1179_v3 = vpop.f32.mrb[55].mxu1 }
 0x18e   : > { %v2199_v53 = vpack.c.bf16 %v1522_v47, %v1522_v47  ;;  %v1454_v63 = vmul.f32 %v2864_v36, %v1385_v59  ;;  %v1256_v1 = vadd.f32 %v1177_v61, %v391_v51 }
 0x18f   : > { %1811 = vst.msk [vmem:[%s2885_s8 + $0x5c] sm:$0xf] %vm1787_vm1, %v2167_v52  ;;  %v1491_v6 = vadd.f32 %v2869_v46, %v1422_v62  ;;  %v363_v52 = vld [vmem:[#allocation2 + $0xf8] sm:$0xff] }
 0x190   : > { %1843 = vst.msk [vmem:[%s2885_s8 + $0xdc] sm:$0xf] %vm1787_vm1, %v2199_v53  ;;  %v1354_v4 = vld [vmem:[#allocation2 + $0xc8] sm:$0xff]  ;;  %v1523_v7 = vadd.f32 %v2869_v46, %v1454_v63  ;;  %v395_v53 = vld [vmem:[#allocation2 + $0x1f8] sm:$0xff] }
 0x191   : > { %v1386_v5 = vld [vmem:[#allocation2 + $0x1c8] sm:$0xff]  ;;  %v1423_v8 = vmul.f32 %v2864_v36, %v1354_v4  ;;  %1289 = vst.msk [vmem:[#allocation2 + $0xd8] sm:$0xff] %vm267_vm0, %v1224_v0  ;;  %1321 = vst.msk [vmem:[#allocation2 + $0x1d8] sm:$0xff] %vm267_vm0, %v1256_v1  ;;  %v2168_v12 = vpack.c.bf16 %v1491_v6, %v1491_v6 }
 0x192   : > { %v1455_v9 = vmul.f32 %v2864_v36, %v1386_v5  ;;  %v2200_v13 = vpack.c.bf16 %v1523_v7, %v1523_v7  ;;  %v1054_v16 = vpop.f32.mrb[56].mxu0  ;;  %v1182_v17 = vpop.f32.mrb[56].mxu1 }
 0x193   : > { %v1492_v14 = vadd.f32 %v2869_v46, %v1423_v8  ;;  %1812 = vst.msk [vmem:[%s2885_s8 + $0x60] sm:$0xf] %vm1787_vm1, %v2168_v12  ;;  %v1225_v21 = vadd.f32 %v1054_v16, %v360_v10  ;;  %v1257_v22 = vadd.f32 %v1182_v17, %v392_v11  ;;  %v1056_v23 = vpop.f32.mrb[57].mxu0  ;;  %v1184_v24 = vpop.f32.mrb[57].mxu1 }
 0x194   : > { %v1524_v15 = vadd.f32 %v2869_v46, %v1455_v9  ;;  %1844 = vst.msk [vmem:[%s2885_s8 + $0xe0] sm:$0xf] %vm1787_vm1, %v2200_v13  ;;  %v1355_v25 = vld [vmem:[#allocation2 + $0xd0] sm:$0xff]  ;;  %v1057_v27 = vpop.f32.mrb[58].mxu0  ;;  %v1185_v46 = vpop.f32.mrb[58].mxu1 }
 0x195   : > { %v2169_v36 = vpack.c.bf16 %v1492_v14, %v1492_v14  ;;  %v1387_v26 = vld [vmem:[#allocation2 + $0x1d0] sm:$0xff]  ;;  %v1424_v29 = vmul.f32 %v3138_v28, %v1355_v25  ;;  %1290 = vst.msk [vmem:[#allocation2 + $0xe0] sm:$0xff] %vm267_vm0, %v1225_v21  ;;  %1322 = vst.msk [vmem:[#allocation2 + $0x1e0] sm:$0xff] %vm267_vm0, %v1257_v22  ;;  %v1226_v31 = vadd.f32 %v1057_v27, %v361_v18  ;;  %v1059_v33 = vpop.f32.mrb[59].mxu0  ;;  %v1187_v34 = vpop.f32.mrb[59].mxu1 }
 0x196   : > { %v2201_v20 = vpack.c.bf16 %v1524_v15, %v1524_v15  ;;  %v1456_v30 = vmul.f32 %v3138_v28, %v1387_v26  ;;  %v1258_v32 = vadd.f32 %v1185_v46, %v393_v19 }
 0x197   : > { %1813 = vst.msk [vmem:[%s2885_s8 + $0x64] sm:$0xf] %vm1787_vm1, %v2169_v36  ;;  %v1493_v39 = vadd.f32 %v3147_v38, %v1424_v29 }
 0x198   : > { %1845 = vst.msk [vmem:[%s2885_s8 + $0xe4] sm:$0xf] %vm1787_vm1, %v2201_v20  ;;  %v1356_v35 = vld [vmem:[#allocation2 + $0xd8] sm:$0xff]  ;;  %v1525_v40 = vadd.f32 %v3147_v38, %v1456_v30 }
 0x199   : > { %v1388_v37 = vld [vmem:[#allocation2 + $0x1d8] sm:$0xff]  ;;  %v1425_v41 = vmul.f32 %v3138_v28, %v1356_v35  ;;  %1291 = vst.msk [vmem:[#allocation2 + $0xe8] sm:$0xff] %vm267_vm0, %v1226_v31  ;;  %1323 = vst.msk [vmem:[#allocation2 + $0x1e8] sm:$0xff] %vm267_vm0, %v1258_v32  ;;  %v2170_v45 = vpack.c.bf16 %v1493_v39, %v1493_v39 }
 0x19a   : > { %v1457_v42 = vmul.f32 %v3138_v28, %v1388_v37  ;;  %v2202_v47 = vpack.c.bf16 %v1525_v40, %v1525_v40  ;;  %v1062_v50 = vpop.f32.mrb[60].mxu0  ;;  %v1190_v51 = vpop.f32.mrb[60].mxu1 }
 0x19b   : > { %v1494_v48 = vadd.f32 %v3147_v38, %v1425_v41  ;;  %1814 = vst.msk [vmem:[%s2885_s8 + $0x68] sm:$0xf] %vm1787_vm1, %v2170_v45  ;;  %v1227_v56 = vadd.f32 %v1062_v50, %v362_v43  ;;  %v1259_v57 = vadd.f32 %v1190_v51, %v394_v44  ;;  %v1064_v58 = vpop.f32.mrb[61].mxu0  ;;  %v1192_v59 = vpop.f32.mrb[61].mxu1 }
 0x19c   : > { %v1526_v49 = vadd.f32 %v3147_v38, %v1457_v42  ;;  %1846 = vst.msk [vmem:[%s2885_s8 + $0xe8] sm:$0xf] %vm1787_vm1, %v2202_v47  ;;  %v1357_v60 = vld [vmem:[#allocation2 + $0xe0] sm:$0xff]  ;;  %v1065_v62 = vpop.f32.mrb[62].mxu0  ;;  %v1193_v63 = vpop.f32.mrb[62].mxu1 }
 0x19d   : > { %v2171_v54 = vpack.c.bf16 %v1494_v48, %v1494_v48  ;;  %v1389_v61 = vld [vmem:[#allocation2 + $0x1e0] sm:$0xff]  ;;  %v1426_v0 = vmul.f32 %v3138_v28, %v1357_v60  ;;  %1292 = vst.msk [vmem:[#allocation2 + $0xf0] sm:$0xff] %vm267_vm0, %v1227_v56  ;;  %1324 = vst.msk [vmem:[#allocation2 + $0x1f0] sm:$0xff] %vm267_vm0, %v1259_v57  ;;  %v1228_v2 = vadd.f32 %v1065_v62, %v363_v52  ;;  %v1067_v4 = vpop.f32.mrb[63].mxu0  ;;  %v1195_v5 = vpop.f32.mrb[63].mxu1 }
 0x19e   : > { %v2203_v55 = vpack.c.bf16 %v1526_v49, %v1526_v49  ;;  %v1458_v1 = vmul.f32 %v3138_v28, %v1389_v61  ;;  %v1260_v3 = vadd.f32 %v1193_v63, %v395_v53 }
 0x19f   : > { %1815 = vst.msk [vmem:[%s2885_s8 + $0x6c] sm:$0xf] %vm1787_vm1, %v2171_v54  ;;  %v1495_v8 = vadd.f32 %v3147_v38, %v1426_v0 }
 0x1a0   : > { %1847 = vst.msk [vmem:[%s2885_s8 + $0xec] sm:$0xf] %vm1787_vm1, %v2203_v55  ;;  %v1358_v6 = vld [vmem:[#allocation2 + $0xe8] sm:$0xff]  ;;  %v1527_v9 = vadd.f32 %v3147_v38, %v1458_v1 }
 0x1a1   : > { %v1390_v7 = vld [vmem:[#allocation2 + $0x1e8] sm:$0xff]  ;;  %v1427_v10 = vmul.f32 %v3138_v28, %v1358_v6  ;;  %1293 = vst.msk [vmem:[#allocation2 + $0xf8] sm:$0xff] %vm267_vm0, %v1228_v2  ;;  %1325 = vst.msk [vmem:[#allocation2 + $0x1f8] sm:$0xff] %vm267_vm0, %v1260_v3  ;;  %v2172_v12 = vpack.c.bf16 %v1495_v8, %v1495_v8 }
 0x1a2   : > { %v1459_v11 = vmul.f32 %v3138_v28, %v1390_v7  ;;  %v2204_v13 = vpack.c.bf16 %v1527_v9, %v1527_v9 }
 0x1a3   : > { %v1496_v14 = vadd.f32 %v3147_v38, %v1427_v10  ;;  %1816 = vst.msk [vmem:[%s2885_s8 + $0x70] sm:$0xf] %vm1787_vm1, %v2172_v12 }
 0x1a4   : > { %v1528_v15 = vadd.f32 %v3147_v38, %v1459_v11  ;;  %1848 = vst.msk [vmem:[%s2885_s8 + $0xf0] sm:$0xf] %vm1787_vm1, %v2204_v13  ;;  %v1359_v18 = vld [vmem:[#allocation2 + $0xf0] sm:$0xff] }
 0x1a5   : > { %v2173_v16 = vpack.c.bf16 %v1496_v14, %v1496_v14  ;;  %v1391_v19 = vld [vmem:[#allocation2 + $0x1f0] sm:$0xff]  ;;  %v1428_v36 = vmul.f32 %v3138_v28, %v1359_v18 }
 0x1a6   : > { %v2205_v17 = vpack.c.bf16 %v1528_v15, %v1528_v15  ;;  %v1460_v20 = vmul.f32 %v3138_v28, %v1391_v19 }
 0x1a7   : > { %1817 = vst.msk [vmem:[%s2885_s8 + $0x74] sm:$0xf] %vm1787_vm1, %v2173_v16  ;;  %v1497_v23 = vadd.f32 %v3147_v38, %v1428_v36 }
 0x1a8   : > { %1849 = vst.msk [vmem:[%s2885_s8 + $0xf4] sm:$0xf] %vm1787_vm1, %v2205_v17  ;;  %v1360_v21 = vld [vmem:[#allocation2 + $0xf8] sm:$0xff]  ;;  %v1529_v24 = vadd.f32 %v3147_v38, %v1460_v20 }
 0x1a9   : > { %v1392_v22 = vld [vmem:[#allocation2 + $0x1f8] sm:$0xff]  ;;  %v1429_v25 = vmul.f32 %v3138_v28, %v1360_v21  ;;  %v2174_v27 = vpack.c.bf16 %v1497_v23, %v1497_v23 }
 0x1aa   : > { %v1461_v26 = vmul.f32 %v3138_v28, %v1392_v22  ;;  %v2206_v46 = vpack.c.bf16 %v1529_v24, %v1529_v24 }
 0x1ab   : > { %v1498_v29 = vadd.f32 %v3147_v38, %v1429_v25  ;;  %1818 = vst.msk [vmem:[%s2885_s8 + $0x78] sm:$0xf] %vm1787_vm1, %v2174_v27 }
 0x1ac   : > { %v1530_v30 = vadd.f32 %v3147_v38, %v1461_v26  ;;  %1850 = vst.msk [vmem:[%s2885_s8 + $0xf8] sm:$0xf] %vm1787_vm1, %v2206_v46 }
 0x1ad   : > { %v2175_v28 = vpack.c.bf16 %v1498_v29, %v1498_v29 }
 0x1ae   : > { %v2207_v31 = vpack.c.bf16 %v1530_v30, %v1530_v30 }
 0x1af   : > { %1819 = vst.msk [vmem:[%s2885_s8 + $0x7c] sm:$0xf] %vm1787_vm1, %v2175_v28 }
 0x1b0   : > { %1851 = vst.msk [vmem:[%s2885_s8 + $0xfc] sm:$0xf] %vm1787_vm1, %v2207_v31 }
 0x1b1   : > { %2427 = shalt.err (!%p2424_p5)
}
 0x1b2   : > { %s2428_s19 = scalar_lea.hbm %s3198_s28, 4096  ;;  %s2432_s8 = scalar_lea.hbm %s3261_s3, 16384 }
 0x1b3   : > { %p2429_p6 = scmp.ne.s32.totalorder %s3198_s28, %s2428_s19  ;;  %p2433_p10 = scmp.lt.u32.totalorder %s3198_s28, %s3261_s3 }
 0x1b4   : > { %p2434_p11 = scmp.lt.u32.totalorder %s2432_s8, %s2428_s19  ;;  %p2436_p13 = scmp.lt.u32.totalorder %s2428_s19, %s3198_s28 }
 0x1b5   : > { %p2430_p7 = pnand %p2429_p6, %p2559_p4 }
 0x1b6   : > { %p2435_p12 = por %p2434_p11, %p2433_p10 }
 0x1b7   : > { %p2431_p9 = pneg %p2430_p7 }
 0x1b8   : > { %p2437_p0 = por %p2436_p13, %p2435_p12 }
 0x1ba   : > { %p2438_p1 = pnand %p2437_p0, %p2431_p9 }
 0x1bc   : > { %2441 = shalt.err (!%p2438_p1)
}
 0x1bd   : > { %s2497_s11 = smov 64   ;;  %s2498_s18 = smov 4  }
 0x1be   : > { %2241 = dma.vmem_to_hbm [thread:$0]  (%p2559_p4), %s3200_s23, 4096, %s3198_s28, %s3212_s15, %s2497_s11, %s2497_s11, %s2498_s18  }
 0x1bf PF: > { %p2247_p2 = scmp.ge.s32.totalorder %s2492_s17, 2  ;;  %s1882_s21 = sand.u32 1, %s2472_s12  }
 0x1c0   : > { %s1883_s26 = scalar_lea.sflag [#allocation4], %s1882_s21 }
 0x1c1   : > { %p2244_p3 = pnand %p2247_p2, %p2566_p8 }
 0x1c3   : > { %2467 = dma.done.wait (!%p2244_p3), %s1883_s26, 4096  }
 0x1c4   : > { %2469 = vsyncadd (!%p2244_p3), %s1883_s26, 4294963200  ;;  %s16_s17 = sadd.s32 1, %s2492_s17   ;;  %s3264_s12 = smov %s2476_s13 }
 0x1c5   : > { %p13_p5 = scmp.ge.s32.totalorder %s16_s17, 6   ;;  %s3265_s13 = smov %s2480_s14 }
 0x1c6   : > { %s3266_s14 = smov %s2572_s25  ;;  %s3267_s15 = smov %s2488_s16 }
 0x1c7   : > { %s3268_s16 = smov %s3270_s20  ;;  %15 = sbr.rel (!%p13_p5) target bundleno = 4 (0x4), region = 81 }
 0x1ce   :  { %1888 = vsyncpa [#allocation4], 1 }
 0x1cf   :  { %1890 = vsyncpa [#allocation4 + $0x1], 1 }

</bundles_post_ra>
